<compile_context>
chip_gen: v7x
topology: tpu7x:2x2x1
jax: 0.10.0
libtpu: 0.0.40
codegen_flags: <defaults>
</compile_context>

<pallas_src>
import functools
import math

import jax
import jax.numpy as jnp
from jax.experimental import pallas as pl
from jax.experimental.pallas import tpu as pltpu

# ----------------------------- model config ---------------------------------
D_MODEL = 32          # bert hidden size ("self.dim")
N_HEADS = 4
D_HEAD = D_MODEL // N_HEADS
D_FFN = 64
N_LAYERS = 2
VOCAB = 103
MAX_LEN = 16          # "self.max_len" (position embeddings)
LN_EPS = 1e-12        # BERT layernorm eps
MATMUL_DTYPE = jnp.bfloat16   # MXU operand dtype (accumulation stays f32)


# ----------------------------- in-kernel helpers ------------------------------
def _layer_norm(x, g, b):
    """Row-wise layernorm over the hidden (lane) axis. x:(M,D), g,b:(1,D)."""
    mean = jnp.mean(x, axis=-1, keepdims=True)
    xc = x - mean
    var = jnp.mean(xc * xc, axis=-1, keepdims=True)
    return xc * jax.lax.rsqrt(var + LN_EPS) * g + b


def _gelu(x):
    # tanh-approx GELU (EUP-friendly).
    # TODO(synk): HF BERT's default is exact erf-GELU; tanh approximation is
    # used here for a guaranteed-clean Mosaic lowering (tiny numeric delta).
    c = 0.7978845608028654  # sqrt(2/pi)
    return 0.5 * x * (1.0 + jnp.tanh(c * (x + 0.044715 * x * x * x)))


# ----------------------------- fused encoder kernel ---------------------------
def _encoder_kernel(x_ref, bias_ref, eg_ref, eb_ref,
                    wqkv_ref, bqkv_ref, wo_ref, bo_ref,
                    ln1g_ref, ln1b_ref, w1_ref, b1_ref,
                    w2_ref, b2_ref, ln2g_ref, ln2b_ref,
                    o_ref, *, B, S, D, H, L):
    """Full BERT encoder for one batch tile, entirely in VMEM.

    x_ref:    (B*S, D)   embedding sum (pre embedding-LN), f32
    bias_ref: (B, 1, S)  additive key mask bias, (1-mask)*-10000, f32
    weights:  stacked per layer on a leading L axis (static indexing);
              matmul weights in bf16, biases / LN params in f32
    o_ref:    (B*S, D)   last-layer hidden states, f32
    """
    Dh = D // H
    h = _layer_norm(x_ref[...], eg_ref[...], eb_ref[...])        # (B*S, D) f32
    bias = bias_ref[...]                                          # (B, 1, S)

    for l in range(L):                                            # L=2: static OK
        wqkv = wqkv_ref[l]                                        # (D, 3D) bf16
        wo = wo_ref[l]                                            # (D, D)  bf16
        mdt = wqkv.dtype

        # fused QKV projection: one MXU pass, lanes 0:D | D:2D | 2D:3D.
        # (1/sqrt(Dh) already folded into the Q columns at init time.)
        qkv = jnp.dot(h.astype(mdt), wqkv,
                      preferred_element_type=jnp.float32) + bqkv_ref[l]
        q = qkv[:, 0:D].reshape(B, S, D)
        k = qkv[:, D:2 * D].reshape(B, S, D)
        v = qkv[:, 2 * D:3 * D].reshape(B, S, D)

        # Attention: batched over the batch axis; small static loop over heads
        # (heads live on the lane axis, so head-batching would need a real
        # transpose -- H=4 batched dots per layer is already cheap).
        ctx_heads = []
        for hh in range(H):
            sl = slice(hh * Dh, (hh + 1) * Dh)
            s = jax.lax.dot_general(                               # (B, S, S)
                q[:, :, sl], k[:, :, sl],
                (((2,), (2,)), ((0,), (0,))),
                preferred_element_type=jnp.float32)
            s = s + bias                                           # key mask
            s = s - jnp.max(s, axis=-1, keepdims=True)
            p = jnp.exp(s)
            p = p * pl.reciprocal(jnp.sum(p, axis=-1, keepdims=True),
                                  approx=True)
            ctx_heads.append(jax.lax.dot_general(                  # (B, S, Dh)
                p, v[:, :, sl],
                (((2,), (1,)), ((0,), (0,))),
                preferred_element_type=jnp.float32))

        # Re-assemble heads on the lane axis (D=32 -> single vreg) and do ONE
        # output projection per layer.
        ctx = jnp.concatenate(ctx_heads, axis=-1).reshape(B * S, D)
        attn = jnp.dot(ctx.astype(mdt), wo,
                       preferred_element_type=jnp.float32) + bo_ref[l]
        h1 = _layer_norm(attn + h, ln1g_ref[l], ln1b_ref[l])

        # FFN (GELU) + residual LN.
        f = jnp.dot(h1.astype(mdt), w1_ref[l],
                    preferred_element_type=jnp.float32) + b1_ref[l]
        f = _gelu(f)
        f = jnp.dot(f.astype(mdt), w2_ref[l],
                    preferred_element_type=jnp.float32) + b2_ref[l]
        h = _layer_norm(f + h1, ln2g_ref[l], ln2b_ref[l])

    o_ref[...] = h


# ----------------------------- wrapper ----------------------------------------
def _num_parallel_blocks(batch):
    """Split the subbatch across TensorCores only on 2-TC chips (v7x)."""
    try:
        kind = jax.devices()[0].device_kind.lower()
    except Exception:
        kind = ""
    nb = 2 if ("v7" in kind or "7x" in kind) else 1
    if batch % nb != 0:
        nb = 1
    return nb


@jax.jit
def _annotate(input_ids, attention_mask, params):
    """input_ids, attention_mask: (B, S) int32. Returns (B, D) CLS embeddings."""
    B, S = input_ids.shape
    L, D, F = N_LAYERS, D_MODEL, D_FFN

    emb = (params["word_emb"][input_ids]
           + params["pos_emb"][:S][None, :, :]
           + params["type_emb"][0][None, None, :])               # (B, S, D) f32
    x = emb.reshape(B * S, D)
    # additive key-mask bias, precomputed once per subbatch
    mask_bias = ((1.0 - attention_mask.astype(jnp.float32)) * (-10000.0)
                 ).reshape(B, 1, S)

    nb = _num_parallel_blocks(B)
    Bb = B // nb

    batch2 = lambda i: (i, 0)          # arrays sliced along the batch axis
    batch3 = lambda i: (i, 0, 0)
    fixed2 = lambda i: (0, 0)          # replicated (weights)
    fixed3 = lambda i: (0, 0, 0)

    in_specs = [
        pl.BlockSpec((Bb * S, D), batch2),        # x
        pl.BlockSpec((Bb, 1, S), batch3),         # mask bias
        pl.BlockSpec((1, D), fixed2),             # emb_ln_g
        pl.BlockSpec((1, D), fixed2),             # emb_ln_b
        pl.BlockSpec((L, D, 3 * D), fixed3),      # wqkv
        pl.BlockSpec((L, 1, 3 * D), fixed3),      # bqkv
        pl.BlockSpec((L, D, D), fixed3),          # wo
        pl.BlockSpec((L, 1, D), fixed3),          # bo
        pl.BlockSpec((L, 1, D), fixed3),          # ln1_g
        pl.BlockSpec((L, 1, D), fixed3),          # ln1_b
        pl.BlockSpec((L, D, F), fixed3),          # w1
        pl.BlockSpec((L, 1, F), fixed3),          # b1
        pl.BlockSpec((L, F, D), fixed3),          # w2
        pl.BlockSpec((L, 1, D), fixed3),          # b2
        pl.BlockSpec((L, 1, D), fixed3),          # ln2_g
        pl.BlockSpec((L, 1, D), fixed3),          # ln2_b
    ]
    out_specs = pl.BlockSpec((Bb * S, D), batch2)

    kernel = functools.partial(_encoder_kernel, B=Bb, S=S, D=D,
                               H=N_HEADS, L=N_LAYERS)
    h = pl.pallas_call(
        kernel,
        out_shape=jax.ShapeDtypeStruct((B * S, D), jnp.float32),
        grid_spec=pltpu.PrefetchScalarGridSpec(
            num_scalar_prefetch=0,
            grid=(nb,),
            in_specs=in_specs,
            out_specs=out_specs),
        compiler_params=pltpu.CompilerParams(
            dimension_semantics=("parallel",)),
    )(x, mask_bias,
      params["emb_ln_g"], params["emb_ln_b"],
      params["wqkv"], params["bqkv"], params["wo"], params["bo"],
      params["ln1_g"], params["ln1_b"], params["w1"], params["b1"],
      params["w2"], params["b2"], params["ln2_g"], params["ln2_b"])

    return h.reshape(B, S, D)[:, 0]                              # features[:, 0]


def sentence_bert_forward(input_ids, attention_mask, params, subbatch_size=64):
    """Mirrors SentenceBert.forward: subbatch, annotate, concat along dim 0."""
    n = input_ids.shape[0]
    chunks = []
    for i in range(0, n, subbatch_size):
        chunks.append(_annotate(input_ids[i:i + subbatch_size],
                                attention_mask[i:i + subbatch_size], params))
    return chunks[0] if len(chunks) == 1 else jnp.concatenate(chunks, axis=0)


# ----------------------------- deterministic params ---------------------------
def init_params(key):
    keys = iter(jax.random.split(key, 64))

    def nrm(shape, scale=0.02):
        return (jax.random.normal(next(keys), shape) * scale).astype(jnp.float32)

    L, D, F = N_LAYERS, D_MODEL, D_FFN
    q_scale = 1.0 / math.sqrt(D_HEAD)

    # fused [Wq | Wk | Wv]; fold the 1/sqrt(Dh) attention scale into Q columns.
    wqkv = nrm((L, D, 3 * D))
    wqkv = wqkv.at[:, :, :D].multiply(q_scale)
    bqkv = jnp.zeros((L, 1, 3 * D), jnp.float32)
    bqkv = bqkv.at[:, :, :D].multiply(q_scale)

    return {
        "word_emb": nrm((VOCAB, D)),
        "pos_emb": nrm((MAX_LEN, D)),
        "type_emb": nrm((2, D)),
        "emb_ln_g": jnp.ones((1, D), jnp.float32),
        "emb_ln_b": jnp.zeros((1, D), jnp.float32),
        "wqkv": wqkv.astype(MATMUL_DTYPE),
        "bqkv": bqkv,
        "wo": nrm((L, D, D)).astype(MATMUL_DTYPE),
        "bo": jnp.zeros((L, 1, D), jnp.float32),
        "ln1_g": jnp.ones((L, 1, D), jnp.float32),
        "ln1_b": jnp.zeros((L, 1, D), jnp.float32),
        "w1": nrm((L, D, F)).astype(MATMUL_DTYPE),
        "b1": jnp.zeros((L, 1, F), jnp.float32),
        "w2": nrm((L, F, D)).astype(MATMUL_DTYPE),
        "b2": jnp.zeros((L, 1, D), jnp.float32),
        "ln2_g": jnp.ones((L, 1, D), jnp.float32),
        "ln2_b": jnp.zeros((L, 1, D), jnp.float32),
    }


# ----------------------------- main -------------------------------------------
if __name__ == "__main__":
    key = jax.random.PRNGKey(0)
    k_param, k_ids = jax.random.split(key)

    params = init_params(k_param)

    B, S = 2, 8   # 2 "sentences", up to 8 tokens each (<= MAX_LEN)
    input_ids = jax.random.randint(k_ids, (B, S), 1, VOCAB, dtype=jnp.int32)
    # second sentence has 2 padding positions, mirroring the zero-padded
    # all_input_ids / all_input_mask construction in annotate()
    attention_mask = jnp.array([[1, 1, 1, 1, 1, 1, 1, 1],
                                [1, 1, 1, 1, 1, 1, 0, 0]], dtype=jnp.int32)
    input_ids = input_ids * attention_mask

    out = sentence_bert_forward(input_ids, attention_mask, params, subbatch_size=64)
    out = jax.block_until_ready(out)

    assert out.shape == (B, D_MODEL), out.shape
    assert out.dtype == jnp.float32, out.dtype
    assert bool(jnp.all(jnp.isfinite(out)))
    print("KERNEL_OK")
</pallas_src>

<mosaic_0001>
module attributes {stable_mosaic.version = 11 : i64} {
  func.func @_encoder_kernel(%arg0: i32, %arg1: memref<16x32xf32, #tpu.memory_space<vmem>>, %arg2: memref<2x1x8xf32, #tpu.memory_space<vmem>>, %arg3: memref<1x32xf32, #tpu.memory_space<vmem>>, %arg4: memref<1x32xf32, #tpu.memory_space<vmem>>, %arg5: memref<2x32x96xbf16, #tpu.memory_space<vmem>>, %arg6: memref<2x1x96xf32, #tpu.memory_space<vmem>>, %arg7: memref<2x32x32xbf16, #tpu.memory_space<vmem>>, %arg8: memref<2x1x32xf32, #tpu.memory_space<vmem>>, %arg9: memref<2x1x32xf32, #tpu.memory_space<vmem>>, %arg10: memref<2x1x32xf32, #tpu.memory_space<vmem>>, %arg11: memref<2x32x64xbf16, #tpu.memory_space<vmem>>, %arg12: memref<2x1x64xf32, #tpu.memory_space<vmem>>, %arg13: memref<2x64x32xbf16, #tpu.memory_space<vmem>>, %arg14: memref<2x1x32xf32, #tpu.memory_space<vmem>>, %arg15: memref<2x1x32xf32, #tpu.memory_space<vmem>>, %arg16: memref<2x1x32xf32, #tpu.memory_space<vmem>>, %arg17: memref<16x32xf32, #tpu.memory_space<vmem>>) attributes {dimension_semantics = [#tpu.dimension_semantics<parallel>], iteration_bounds = array<i64: 1>, scalar_prefetch = 0 : i64, scratch_operands = 0 : i64, tpu.core_type = #tpu.core_type<tc>, window_params = [{transform_indices = @transform_0, window_bounds = array<i64: 16, 32>}, {transform_indices = @transform_1, window_bounds = array<i64: 2, 1, 8>}, {pipeline_mode = #tpu.pipeline_mode<synchronous>, transform_indices = @transform_2, window_bounds = array<i64: 1, 32>}, {pipeline_mode = #tpu.pipeline_mode<synchronous>, transform_indices = @transform_3, window_bounds = array<i64: 1, 32>}, {pipeline_mode = #tpu.pipeline_mode<synchronous>, transform_indices = @transform_4, window_bounds = array<i64: 2, 32, 96>}, {pipeline_mode = #tpu.pipeline_mode<synchronous>, transform_indices = @transform_5, window_bounds = array<i64: 2, 1, 96>}, {pipeline_mode = #tpu.pipeline_mode<synchronous>, transform_indices = @transform_6, window_bounds = array<i64: 2, 32, 32>}, {pipeline_mode = #tpu.pipeline_mode<synchronous>, transform_indices = @transform_7, window_bounds = array<i64: 2, 1, 32>}, {pipeline_mode = #tpu.pipeline_mode<synchronous>, transform_indices = @transform_8, window_bounds = array<i64: 2, 1, 32>}, {pipeline_mode = #tpu.pipeline_mode<synchronous>, transform_indices = @transform_9, window_bounds = array<i64: 2, 1, 32>}, {pipeline_mode = #tpu.pipeline_mode<synchronous>, transform_indices = @transform_10, window_bounds = array<i64: 2, 32, 64>}, {pipeline_mode = #tpu.pipeline_mode<synchronous>, transform_indices = @transform_11, window_bounds = array<i64: 2, 1, 64>}, {pipeline_mode = #tpu.pipeline_mode<synchronous>, transform_indices = @transform_12, window_bounds = array<i64: 2, 64, 32>}, {pipeline_mode = #tpu.pipeline_mode<synchronous>, transform_indices = @transform_13, window_bounds = array<i64: 2, 1, 32>}, {pipeline_mode = #tpu.pipeline_mode<synchronous>, transform_indices = @transform_14, window_bounds = array<i64: 2, 1, 32>}, {pipeline_mode = #tpu.pipeline_mode<synchronous>, transform_indices = @transform_15, window_bounds = array<i64: 2, 1, 32>}, {transform_indices = @transform_16, window_bounds = array<i64: 16, 32>}]} {
    %c0 = arith.constant 0 : index
    %c0_0 = arith.constant 0 : index
    %0 = vector.load %arg1[%c0, %c0_0] : memref<16x32xf32, #tpu.memory_space<vmem>>, vector<16x32xf32>
    %c0_1 = arith.constant 0 : index
    %c0_2 = arith.constant 0 : index
    %1 = vector.load %arg3[%c0_1, %c0_2] : memref<1x32xf32, #tpu.memory_space<vmem>>, vector<1x32xf32>
    %c0_3 = arith.constant 0 : index
    %c0_4 = arith.constant 0 : index
    %2 = vector.load %arg4[%c0_3, %c0_4] : memref<1x32xf32, #tpu.memory_space<vmem>>, vector<1x32xf32>
    %cst = arith.constant dense<0.000000e+00> : vector<16xf32>
    %3 = vector.multi_reduction <add>, %0, %cst [1] : vector<16x32xf32> to vector<16xf32>
    %4 = vector.shape_cast %3 : vector<16xf32> to vector<16x1xf32>
    %cst_5 = arith.constant 3.200000e+01 : f32
    %5 = vector.broadcast %cst_5 : f32 to vector<16x1xf32>
    %6 = arith.divf %4, %5 : vector<16x1xf32>
    %7 = vector.broadcast %6 : vector<16x1xf32> to vector<16x32xf32>
    %8 = arith.subf %0, %7 : vector<16x32xf32>
    %9 = arith.mulf %8, %8 : vector<16x32xf32>
    %cst_6 = arith.constant dense<0.000000e+00> : vector<16xf32>
    %10 = vector.multi_reduction <add>, %9, %cst_6 [1] : vector<16x32xf32> to vector<16xf32>
    %11 = vector.shape_cast %10 : vector<16xf32> to vector<16x1xf32>
    %cst_7 = arith.constant 3.200000e+01 : f32
    %12 = vector.broadcast %cst_7 : f32 to vector<16x1xf32>
    %13 = arith.divf %11, %12 : vector<16x1xf32>
    %cst_8 = arith.constant 9.99999996E-13 : f32
    %14 = vector.broadcast %cst_8 : f32 to vector<16x1xf32>
    %15 = arith.addf %13, %14 : vector<16x1xf32>
    %16 = math.rsqrt %15 : vector<16x1xf32>
    %17 = vector.broadcast %16 : vector<16x1xf32> to vector<16x32xf32>
    %18 = arith.mulf %8, %17 : vector<16x32xf32>
    %19 = vector.broadcast %1 : vector<1x32xf32> to vector<16x32xf32>
    %20 = arith.mulf %18, %19 : vector<16x32xf32>
    %21 = vector.broadcast %2 : vector<1x32xf32> to vector<16x32xf32>
    %22 = arith.addf %20, %21 : vector<16x32xf32>
    %c0_9 = arith.constant 0 : index
    %c0_10 = arith.constant 0 : index
    %c0_11 = arith.constant 0 : index
    %23 = vector.load %arg2[%c0_9, %c0_10, %c0_11] : memref<2x1x8xf32, #tpu.memory_space<vmem>>, vector<2x1x8xf32>
    %c0_12 = arith.constant 0 : index
    %c0_13 = arith.constant 0 : index
    %c0_14 = arith.constant 0 : index
    %24 = vector.load %arg5[%c0_12, %c0_13, %c0_14] : memref<2x32x96xbf16, #tpu.memory_space<vmem>>, vector<1x32x96xbf16>
    %25 = vector.shape_cast %24 : vector<1x32x96xbf16> to vector<32x96xbf16>
    %c0_15 = arith.constant 0 : index
    %c0_16 = arith.constant 0 : index
    %c0_17 = arith.constant 0 : index
    %26 = vector.load %arg7[%c0_15, %c0_16, %c0_17] : memref<2x32x32xbf16, #tpu.memory_space<vmem>>, vector<1x32x32xbf16>
    %27 = vector.shape_cast %26 : vector<1x32x32xbf16> to vector<32x32xbf16>
    %28 = arith.truncf %22 : vector<16x32xf32> to vector<16x32xbf16>
    %cst_18 = arith.constant dense<0.000000e+00> : vector<16x96xf32>
    %29 = tpu.matmul %28, %25, %cst_18 {dimension_numbers = #tpu.dot_dimension_numbers<[1], [0], [0], [1], [0, 0, 1, 1], [], []>} : vector<16x32xbf16>, vector<32x96xbf16>, vector<16x96xf32> -> vector<16x96xf32>
    %c0_19 = arith.constant 0 : index
    %c0_20 = arith.constant 0 : index
    %c0_21 = arith.constant 0 : index
    %30 = vector.load %arg6[%c0_19, %c0_20, %c0_21] : memref<2x1x96xf32, #tpu.memory_space<vmem>>, vector<1x1x96xf32>
    %31 = vector.shape_cast %30 : vector<1x1x96xf32> to vector<1x96xf32>
    %32 = vector.broadcast %31 : vector<1x96xf32> to vector<16x96xf32>
    %33 = arith.addf %29, %32 : vector<16x96xf32>
    %34 = vector.extract_strided_slice %33 {offsets = [0, 0], sizes = [16, 32], strides = [1, 1]} : vector<16x96xf32> to vector<16x32xf32>
    %35 = vector.shape_cast %34 : vector<16x32xf32> to vector<2x8x32xf32>
    %36 = vector.extract_strided_slice %33 {offsets = [0, 32], sizes = [16, 32], strides = [1, 1]} : vector<16x96xf32> to vector<16x32xf32>
    %37 = vector.shape_cast %36 : vector<16x32xf32> to vector<2x8x32xf32>
    %38 = vector.extract_strided_slice %33 {offsets = [0, 64], sizes = [16, 32], strides = [1, 1]} : vector<16x96xf32> to vector<16x32xf32>
    %39 = vector.shape_cast %38 : vector<16x32xf32> to vector<2x8x32xf32>
    %40 = vector.extract_strided_slice %35 {offsets = [0, 0, 0], sizes = [2, 8, 8], strides = [1, 1, 1]} : vector<2x8x32xf32> to vector<2x8x8xf32>
    %41 = vector.extract_strided_slice %37 {offsets = [0, 0, 0], sizes = [2, 8, 8], strides = [1, 1, 1]} : vector<2x8x32xf32> to vector<2x8x8xf32>
    %cst_22 = arith.constant dense<0.000000e+00> : vector<2x8x8xf32>
    %42 = tpu.matmul %40, %41, %cst_22 {dimension_numbers = #tpu.dot_dimension_numbers<[2], [2], [1], [1], [0, 0, 0, 1, 1, 1], [0], [0]>} : vector<2x8x8xf32>, vector<2x8x8xf32>, vector<2x8x8xf32> -> vector<2x8x8xf32>
    %43 = vector.broadcast %23 : vector<2x1x8xf32> to vector<2x8x8xf32>
    %44 = arith.addf %42, %43 : vector<2x8x8xf32>
    %cst_23 = arith.constant dense<0xFF800000> : vector<2x8xf32>
    %45 = vector.multi_reduction <maximumf>, %44, %cst_23 [2] : vector<2x8x8xf32> to vector<2x8xf32>
    %46 = vector.shape_cast %45 : vector<2x8xf32> to vector<2x8x1xf32>
    %47 = vector.broadcast %46 : vector<2x8x1xf32> to vector<2x8x8xf32>
    %48 = arith.subf %44, %47 : vector<2x8x8xf32>
    %49 = math.exp %48 : vector<2x8x8xf32>
    %cst_24 = arith.constant dense<0.000000e+00> : vector<2x8xf32>
    %50 = vector.multi_reduction <add>, %49, %cst_24 [2] : vector<2x8x8xf32> to vector<2x8xf32>
    %51 = vector.shape_cast %50 : vector<2x8xf32> to vector<2x8x1xf32>
    %52 = tpu.reciprocal %51 {approx = true} : vector<2x8x1xf32> -> vector<2x8x1xf32>
    %53 = vector.broadcast %52 : vector<2x8x1xf32> to vector<2x8x8xf32>
    %54 = arith.mulf %49, %53 : vector<2x8x8xf32>
    %55 = vector.extract_strided_slice %39 {offsets = [0, 0, 0], sizes = [2, 8, 8], strides = [1, 1, 1]} : vector<2x8x32xf32> to vector<2x8x8xf32>
    %cst_25 = arith.constant dense<0.000000e+00> : vector<2x8x8xf32>
    %56 = tpu.matmul %54, %55, %cst_25 {dimension_numbers = #tpu.dot_dimension_numbers<[2], [1], [1], [2], [0, 0, 0, 1, 1, 2], [0], [0]>} : vector<2x8x8xf32>, vector<2x8x8xf32>, vector<2x8x8xf32> -> vector<2x8x8xf32>
    %57 = vector.extract_strided_slice %35 {offsets = [0, 0, 8], sizes = [2, 8, 8], strides = [1, 1, 1]} : vector<2x8x32xf32> to vector<2x8x8xf32>
    %58 = vector.extract_strided_slice %37 {offsets = [0, 0, 8], sizes = [2, 8, 8], strides = [1, 1, 1]} : vector<2x8x32xf32> to vector<2x8x8xf32>
    %cst_26 = arith.constant dense<0.000000e+00> : vector<2x8x8xf32>
    %59 = tpu.matmul %57, %58, %cst_26 {dimension_numbers = #tpu.dot_dimension_numbers<[2], [2], [1], [1], [0, 0, 0, 1, 1, 1], [0], [0]>} : vector<2x8x8xf32>, vector<2x8x8xf32>, vector<2x8x8xf32> -> vector<2x8x8xf32>
    %60 = vector.broadcast %23 : vector<2x1x8xf32> to vector<2x8x8xf32>
    %61 = arith.addf %59, %60 : vector<2x8x8xf32>
    %cst_27 = arith.constant dense<0xFF800000> : vector<2x8xf32>
    %62 = vector.multi_reduction <maximumf>, %61, %cst_27 [2] : vector<2x8x8xf32> to vector<2x8xf32>
    %63 = vector.shape_cast %62 : vector<2x8xf32> to vector<2x8x1xf32>
    %64 = vector.broadcast %63 : vector<2x8x1xf32> to vector<2x8x8xf32>
    %65 = arith.subf %61, %64 : vector<2x8x8xf32>
    %66 = math.exp %65 : vector<2x8x8xf32>
    %cst_28 = arith.constant dense<0.000000e+00> : vector<2x8xf32>
    %67 = vector.multi_reduction <add>, %66, %cst_28 [2] : vector<2x8x8xf32> to vector<2x8xf32>
    %68 = vector.shape_cast %67 : vector<2x8xf32> to vector<2x8x1xf32>
    %69 = tpu.reciprocal %68 {approx = true} : vector<2x8x1xf32> -> vector<2x8x1xf32>
    %70 = vector.broadcast %69 : vector<2x8x1xf32> to vector<2x8x8xf32>
    %71 = arith.mulf %66, %70 : vector<2x8x8xf32>
    %72 = vector.extract_strided_slice %39 {offsets = [0, 0, 8], sizes = [2, 8, 8], strides = [1, 1, 1]} : vector<2x8x32xf32> to vector<2x8x8xf32>
    %cst_29 = arith.constant dense<0.000000e+00> : vector<2x8x8xf32>
    %73 = tpu.matmul %71, %72, %cst_29 {dimension_numbers = #tpu.dot_dimension_numbers<[2], [1], [1], [2], [0, 0, 0, 1, 1, 2], [0], [0]>} : vector<2x8x8xf32>, vector<2x8x8xf32>, vector<2x8x8xf32> -> vector<2x8x8xf32>
    %74 = vector.extract_strided_slice %35 {offsets = [0, 0, 16], sizes = [2, 8, 8], strides = [1, 1, 1]} : vector<2x8x32xf32> to vector<2x8x8xf32>
    %75 = vector.extract_strided_slice %37 {offsets = [0, 0, 16], sizes = [2, 8, 8], strides = [1, 1, 1]} : vector<2x8x32xf32> to vector<2x8x8xf32>
    %cst_30 = arith.constant dense<0.000000e+00> : vector<2x8x8xf32>
    %76 = tpu.matmul %74, %75, %cst_30 {dimension_numbers = #tpu.dot_dimension_numbers<[2], [2], [1], [1], [0, 0, 0, 1, 1, 1], [0], [0]>} : vector<2x8x8xf32>, vector<2x8x8xf32>, vector<2x8x8xf32> -> vector<2x8x8xf32>
    %77 = vector.broadcast %23 : vector<2x1x8xf32> to vector<2x8x8xf32>
    %78 = arith.addf %76, %77 : vector<2x8x8xf32>
    %cst_31 = arith.constant dense<0xFF800000> : vector<2x8xf32>
    %79 = vector.multi_reduction <maximumf>, %78, %cst_31 [2] : vector<2x8x8xf32> to vector<2x8xf32>
    %80 = vector.shape_cast %79 : vector<2x8xf32> to vector<2x8x1xf32>
    %81 = vector.broadcast %80 : vector<2x8x1xf32> to vector<2x8x8xf32>
    %82 = arith.subf %78, %81 : vector<2x8x8xf32>
    %83 = math.exp %82 : vector<2x8x8xf32>
    %cst_32 = arith.constant dense<0.000000e+00> : vector<2x8xf32>
    %84 = vector.multi_reduction <add>, %83, %cst_32 [2] : vector<2x8x8xf32> to vector<2x8xf32>
    %85 = vector.shape_cast %84 : vector<2x8xf32> to vector<2x8x1xf32>
    %86 = tpu.reciprocal %85 {approx = true} : vector<2x8x1xf32> -> vector<2x8x1xf32>
    %87 = vector.broadcast %86 : vector<2x8x1xf32> to vector<2x8x8xf32>
    %88 = arith.mulf %83, %87 : vector<2x8x8xf32>
    %89 = vector.extract_strided_slice %39 {offsets = [0, 0, 16], sizes = [2, 8, 8], strides = [1, 1, 1]} : vector<2x8x32xf32> to vector<2x8x8xf32>
    %cst_33 = arith.constant dense<0.000000e+00> : vector<2x8x8xf32>
    %90 = tpu.matmul %88, %89, %cst_33 {dimension_numbers = #tpu.dot_dimension_numbers<[2], [1], [1], [2], [0, 0, 0, 1, 1, 2], [0], [0]>} : vector<2x8x8xf32>, vector<2x8x8xf32>, vector<2x8x8xf32> -> vector<2x8x8xf32>
    %91 = vector.extract_strided_slice %35 {offsets = [0, 0, 24], sizes = [2, 8, 8], strides = [1, 1, 1]} : vector<2x8x32xf32> to vector<2x8x8xf32>
    %92 = vector.extract_strided_slice %37 {offsets = [0, 0, 24], sizes = [2, 8, 8], strides = [1, 1, 1]} : vector<2x8x32xf32> to vector<2x8x8xf32>
    %cst_34 = arith.constant dense<0.000000e+00> : vector<2x8x8xf32>
    %93 = tpu.matmul %91, %92, %cst_34 {dimension_numbers = #tpu.dot_dimension_numbers<[2], [2], [1], [1], [0, 0, 0, 1, 1, 1], [0], [0]>} : vector<2x8x8xf32>, vector<2x8x8xf32>, vector<2x8x8xf32> -> vector<2x8x8xf32>
    %94 = vector.broadcast %23 : vector<2x1x8xf32> to vector<2x8x8xf32>
    %95 = arith.addf %93, %94 : vector<2x8x8xf32>
    %cst_35 = arith.constant dense<0xFF800000> : vector<2x8xf32>
    %96 = vector.multi_reduction <maximumf>, %95, %cst_35 [2] : vector<2x8x8xf32> to vector<2x8xf32>
    %97 = vector.shape_cast %96 : vector<2x8xf32> to vector<2x8x1xf32>
    %98 = vector.broadcast %97 : vector<2x8x1xf32> to vector<2x8x8xf32>
    %99 = arith.subf %95, %98 : vector<2x8x8xf32>
    %100 = math.exp %99 : vector<2x8x8xf32>
    %cst_36 = arith.constant dense<0.000000e+00> : vector<2x8xf32>
    %101 = vector.multi_reduction <add>, %100, %cst_36 [2] : vector<2x8x8xf32> to vector<2x8xf32>
    %102 = vector.shape_cast %101 : vector<2x8xf32> to vector<2x8x1xf32>
    %103 = tpu.reciprocal %102 {approx = true} : vector<2x8x1xf32> -> vector<2x8x1xf32>
    %104 = vector.broadcast %103 : vector<2x8x1xf32> to vector<2x8x8xf32>
    %105 = arith.mulf %100, %104 : vector<2x8x8xf32>
    %106 = vector.extract_strided_slice %39 {offsets = [0, 0, 24], sizes = [2, 8, 8], strides = [1, 1, 1]} : vector<2x8x32xf32> to vector<2x8x8xf32>
    %cst_37 = arith.constant dense<0.000000e+00> : vector<2x8x8xf32>
    %107 = tpu.matmul %105, %106, %cst_37 {dimension_numbers = #tpu.dot_dimension_numbers<[2], [1], [1], [2], [0, 0, 0, 1, 1, 2], [0], [0]>} : vector<2x8x8xf32>, vector<2x8x8xf32>, vector<2x8x8xf32> -> vector<2x8x8xf32>
    %108 = tpu.concatenate %56, %73, %90, %107 in 2 : vector<2x8x8xf32>, vector<2x8x8xf32>, vector<2x8x8xf32>, vector<2x8x8xf32> -> vector<2x8x32xf32>
    %109 = vector.shape_cast %108 : vector<2x8x32xf32> to vector<16x32xf32>
    %110 = arith.truncf %109 : vector<16x32xf32> to vector<16x32xbf16>
    %cst_38 = arith.constant dense<0.000000e+00> : vector<16x32xf32>
    %111 = tpu.matmul %110, %27, %cst_38 {dimension_numbers = #tpu.dot_dimension_numbers<[1], [0], [0], [1], [0, 0, 1, 1], [], []>} : vector<16x32xbf16>, vector<32x32xbf16>, vector<16x32xf32> -> vector<16x32xf32>
    %c0_39 = arith.constant 0 : index
    %c0_40 = arith.constant 0 : index
    %c0_41 = arith.constant 0 : index
    %112 = vector.load %arg8[%c0_39, %c0_40, %c0_41] : memref<2x1x32xf32, #tpu.memory_space<vmem>>, vector<1x1x32xf32>
    %113 = vector.shape_cast %112 : vector<1x1x32xf32> to vector<1x32xf32>
    %114 = vector.broadcast %113 : vector<1x32xf32> to vector<16x32xf32>
    %115 = arith.addf %111, %114 : vector<16x32xf32>
    %116 = arith.addf %115, %22 : vector<16x32xf32>
    %c0_42 = arith.constant 0 : index
    %c0_43 = arith.constant 0 : index
    %c0_44 = arith.constant 0 : index
    %117 = vector.load %arg9[%c0_42, %c0_43, %c0_44] : memref<2x1x32xf32, #tpu.memory_space<vmem>>, vector<1x1x32xf32>
    %118 = vector.shape_cast %117 : vector<1x1x32xf32> to vector<1x32xf32>
    %c0_45 = arith.constant 0 : index
    %c0_46 = arith.constant 0 : index
    %c0_47 = arith.constant 0 : index
    %119 = vector.load %arg10[%c0_45, %c0_46, %c0_47] : memref<2x1x32xf32, #tpu.memory_space<vmem>>, vector<1x1x32xf32>
    %120 = vector.shape_cast %119 : vector<1x1x32xf32> to vector<1x32xf32>
    %cst_48 = arith.constant dense<0.000000e+00> : vector<16xf32>
    %121 = vector.multi_reduction <add>, %116, %cst_48 [1] : vector<16x32xf32> to vector<16xf32>
    %122 = vector.shape_cast %121 : vector<16xf32> to vector<16x1xf32>
    %cst_49 = arith.constant 3.200000e+01 : f32
    %123 = vector.broadcast %cst_49 : f32 to vector<16x1xf32>
    %124 = arith.divf %122, %123 : vector<16x1xf32>
    %125 = vector.broadcast %124 : vector<16x1xf32> to vector<16x32xf32>
    %126 = arith.subf %116, %125 : vector<16x32xf32>
    %127 = arith.mulf %126, %126 : vector<16x32xf32>
    %cst_50 = arith.constant dense<0.000000e+00> : vector<16xf32>
    %128 = vector.multi_reduction <add>, %127, %cst_50 [1] : vector<16x32xf32> to vector<16xf32>
    %129 = vector.shape_cast %128 : vector<16xf32> to vector<16x1xf32>
    %cst_51 = arith.constant 3.200000e+01 : f32
    %130 = vector.broadcast %cst_51 : f32 to vector<16x1xf32>
    %131 = arith.divf %129, %130 : vector<16x1xf32>
    %cst_52 = arith.constant 9.99999996E-13 : f32
    %132 = vector.broadcast %cst_52 : f32 to vector<16x1xf32>
    %133 = arith.addf %131, %132 : vector<16x1xf32>
    %134 = math.rsqrt %133 : vector<16x1xf32>
    %135 = vector.broadcast %134 : vector<16x1xf32> to vector<16x32xf32>
    %136 = arith.mulf %126, %135 : vector<16x32xf32>
    %137 = vector.broadcast %118 : vector<1x32xf32> to vector<16x32xf32>
    %138 = arith.mulf %136, %137 : vector<16x32xf32>
    %139 = vector.broadcast %120 : vector<1x32xf32> to vector<16x32xf32>
    %140 = arith.addf %138, %139 : vector<16x32xf32>
    %141 = arith.truncf %140 : vector<16x32xf32> to vector<16x32xbf16>
    %c0_53 = arith.constant 0 : index
    %c0_54 = arith.constant 0 : index
    %c0_55 = arith.constant 0 : index
    %142 = vector.load %arg11[%c0_53, %c0_54, %c0_55] : memref<2x32x64xbf16, #tpu.memory_space<vmem>>, vector<1x32x64xbf16>
    %143 = vector.shape_cast %142 : vector<1x32x64xbf16> to vector<32x64xbf16>
    %cst_56 = arith.constant dense<0.000000e+00> : vector<16x64xf32>
    %144 = tpu.matmul %141, %143, %cst_56 {dimension_numbers = #tpu.dot_dimension_numbers<[1], [0], [0], [1], [0, 0, 1, 1], [], []>} : vector<16x32xbf16>, vector<32x64xbf16>, vector<16x64xf32> -> vector<16x64xf32>
    %c0_57 = arith.constant 0 : index
    %c0_58 = arith.constant 0 : index
    %c0_59 = arith.constant 0 : index
    %145 = vector.load %arg12[%c0_57, %c0_58, %c0_59] : memref<2x1x64xf32, #tpu.memory_space<vmem>>, vector<1x1x64xf32>
    %146 = vector.shape_cast %145 : vector<1x1x64xf32> to vector<1x64xf32>
    %147 = vector.broadcast %146 : vector<1x64xf32> to vector<16x64xf32>
    %148 = arith.addf %144, %147 : vector<16x64xf32>
    %cst_60 = arith.constant 5.000000e-01 : f32
    %149 = vector.broadcast %cst_60 : f32 to vector<16x64xf32>
    %150 = arith.mulf %149, %148 : vector<16x64xf32>
    %cst_61 = arith.constant 4.471500e-02 : f32
    %151 = vector.broadcast %cst_61 : f32 to vector<16x64xf32>
    %152 = arith.mulf %151, %148 : vector<16x64xf32>
    %153 = arith.mulf %152, %148 : vector<16x64xf32>
    %154 = arith.mulf %153, %148 : vector<16x64xf32>
    %155 = arith.addf %148, %154 : vector<16x64xf32>
    %cst_62 = arith.constant 0.797884583 : f32
    %156 = vector.broadcast %cst_62 : f32 to vector<16x64xf32>
    %157 = arith.mulf %156, %155 : vector<16x64xf32>
    %158 = math.tanh %157 : vector<16x64xf32>
    %cst_63 = arith.constant 1.000000e+00 : f32
    %159 = vector.broadcast %cst_63 : f32 to vector<16x64xf32>
    %160 = arith.addf %159, %158 : vector<16x64xf32>
    %161 = arith.mulf %150, %160 : vector<16x64xf32>
    %162 = arith.truncf %161 : vector<16x64xf32> to vector<16x64xbf16>
    %c0_64 = arith.constant 0 : index
    %c0_65 = arith.constant 0 : index
    %c0_66 = arith.constant 0 : index
    %163 = vector.load %arg13[%c0_64, %c0_65, %c0_66] : memref<2x64x32xbf16, #tpu.memory_space<vmem>>, vector<1x64x32xbf16>
    %164 = vector.shape_cast %163 : vector<1x64x32xbf16> to vector<64x32xbf16>
    %cst_67 = arith.constant dense<0.000000e+00> : vector<16x32xf32>
    %165 = tpu.matmul %162, %164, %cst_67 {dimension_numbers = #tpu.dot_dimension_numbers<[1], [0], [0], [1], [0, 0, 1, 1], [], []>} : vector<16x64xbf16>, vector<64x32xbf16>, vector<16x32xf32> -> vector<16x32xf32>
    %c0_68 = arith.constant 0 : index
    %c0_69 = arith.constant 0 : index
    %c0_70 = arith.constant 0 : index
    %166 = vector.load %arg14[%c0_68, %c0_69, %c0_70] : memref<2x1x32xf32, #tpu.memory_space<vmem>>, vector<1x1x32xf32>
    %167 = vector.shape_cast %166 : vector<1x1x32xf32> to vector<1x32xf32>
    %168 = vector.broadcast %167 : vector<1x32xf32> to vector<16x32xf32>
    %169 = arith.addf %165, %168 : vector<16x32xf32>
    %170 = arith.addf %169, %140 : vector<16x32xf32>
    %c0_71 = arith.constant 0 : index
    %c0_72 = arith.constant 0 : index
    %c0_73 = arith.constant 0 : index
    %171 = vector.load %arg15[%c0_71, %c0_72, %c0_73] : memref<2x1x32xf32, #tpu.memory_space<vmem>>, vector<1x1x32xf32>
    %172 = vector.shape_cast %171 : vector<1x1x32xf32> to vector<1x32xf32>
    %c0_74 = arith.constant 0 : index
    %c0_75 = arith.constant 0 : index
    %c0_76 = arith.constant 0 : index
    %173 = vector.load %arg16[%c0_74, %c0_75, %c0_76] : memref<2x1x32xf32, #tpu.memory_space<vmem>>, vector<1x1x32xf32>
    %174 = vector.shape_cast %173 : vector<1x1x32xf32> to vector<1x32xf32>
    %cst_77 = arith.constant dense<0.000000e+00> : vector<16xf32>
    %175 = vector.multi_reduction <add>, %170, %cst_77 [1] : vector<16x32xf32> to vector<16xf32>
    %176 = vector.shape_cast %175 : vector<16xf32> to vector<16x1xf32>
    %cst_78 = arith.constant 3.200000e+01 : f32
    %177 = vector.broadcast %cst_78 : f32 to vector<16x1xf32>
    %178 = arith.divf %176, %177 : vector<16x1xf32>
    %179 = vector.broadcast %178 : vector<16x1xf32> to vector<16x32xf32>
    %180 = arith.subf %170, %179 : vector<16x32xf32>
    %181 = arith.mulf %180, %180 : vector<16x32xf32>
    %cst_79 = arith.constant dense<0.000000e+00> : vector<16xf32>
    %182 = vector.multi_reduction <add>, %181, %cst_79 [1] : vector<16x32xf32> to vector<16xf32>
    %183 = vector.shape_cast %182 : vector<16xf32> to vector<16x1xf32>
    %cst_80 = arith.constant 3.200000e+01 : f32
    %184 = vector.broadcast %cst_80 : f32 to vector<16x1xf32>
    %185 = arith.divf %183, %184 : vector<16x1xf32>
    %cst_81 = arith.constant 9.99999996E-13 : f32
    %186 = vector.broadcast %cst_81 : f32 to vector<16x1xf32>
    %187 = arith.addf %185, %186 : vector<16x1xf32>
    %188 = math.rsqrt %187 : vector<16x1xf32>
    %189 = vector.broadcast %188 : vector<16x1xf32> to vector<16x32xf32>
    %190 = arith.mulf %180, %189 : vector<16x32xf32>
    %191 = vector.broadcast %172 : vector<1x32xf32> to vector<16x32xf32>
    %192 = arith.mulf %190, %191 : vector<16x32xf32>
    %193 = vector.broadcast %174 : vector<1x32xf32> to vector<16x32xf32>
    %194 = arith.addf %192, %193 : vector<16x32xf32>
    %c1 = arith.constant 1 : index
    %c0_82 = arith.constant 0 : index
    %c0_83 = arith.constant 0 : index
    %195 = vector.load %arg5[%c1, %c0_82, %c0_83] : memref<2x32x96xbf16, #tpu.memory_space<vmem>>, vector<1x32x96xbf16>
    %196 = vector.shape_cast %195 : vector<1x32x96xbf16> to vector<32x96xbf16>
    %c1_84 = arith.constant 1 : index
    %c0_85 = arith.constant 0 : index
    %c0_86 = arith.constant 0 : index
    %197 = vector.load %arg7[%c1_84, %c0_85, %c0_86] : memref<2x32x32xbf16, #tpu.memory_space<vmem>>, vector<1x32x32xbf16>
    %198 = vector.shape_cast %197 : vector<1x32x32xbf16> to vector<32x32xbf16>
    %199 = arith.truncf %194 : vector<16x32xf32> to vector<16x32xbf16>
    %cst_87 = arith.constant dense<0.000000e+00> : vector<16x96xf32>
    %200 = tpu.matmul %199, %196, %cst_87 {dimension_numbers = #tpu.dot_dimension_numbers<[1], [0], [0], [1], [0, 0, 1, 1], [], []>} : vector<16x32xbf16>, vector<32x96xbf16>, vector<16x96xf32> -> vector<16x96xf32>
    %c1_88 = arith.constant 1 : index
    %c0_89 = arith.constant 0 : index
    %c0_90 = arith.constant 0 : index
    %201 = vector.load %arg6[%c1_88, %c0_89, %c0_90] : memref<2x1x96xf32, #tpu.memory_space<vmem>>, vector<1x1x96xf32>
    %202 = vector.shape_cast %201 : vector<1x1x96xf32> to vector<1x96xf32>
    %203 = vector.broadcast %202 : vector<1x96xf32> to vector<16x96xf32>
    %204 = arith.addf %200, %203 : vector<16x96xf32>
    %205 = vector.extract_strided_slice %204 {offsets = [0, 0], sizes = [16, 32], strides = [1, 1]} : vector<16x96xf32> to vector<16x32xf32>
    %206 = vector.shape_cast %205 : vector<16x32xf32> to vector<2x8x32xf32>
    %207 = vector.extract_strided_slice %204 {offsets = [0, 32], sizes = [16, 32], strides = [1, 1]} : vector<16x96xf32> to vector<16x32xf32>
    %208 = vector.shape_cast %207 : vector<16x32xf32> to vector<2x8x32xf32>
    %209 = vector.extract_strided_slice %204 {offsets = [0, 64], sizes = [16, 32], strides = [1, 1]} : vector<16x96xf32> to vector<16x32xf32>
    %210 = vector.shape_cast %209 : vector<16x32xf32> to vector<2x8x32xf32>
    %211 = vector.extract_strided_slice %206 {offsets = [0, 0, 0], sizes = [2, 8, 8], strides = [1, 1, 1]} : vector<2x8x32xf32> to vector<2x8x8xf32>
    %212 = vector.extract_strided_slice %208 {offsets = [0, 0, 0], sizes = [2, 8, 8], strides = [1, 1, 1]} : vector<2x8x32xf32> to vector<2x8x8xf32>
    %cst_91 = arith.constant dense<0.000000e+00> : vector<2x8x8xf32>
    %213 = tpu.matmul %211, %212, %cst_91 {dimension_numbers = #tpu.dot_dimension_numbers<[2], [2], [1], [1], [0, 0, 0, 1, 1, 1], [0], [0]>} : vector<2x8x8xf32>, vector<2x8x8xf32>, vector<2x8x8xf32> -> vector<2x8x8xf32>
    %214 = vector.broadcast %23 : vector<2x1x8xf32> to vector<2x8x8xf32>
    %215 = arith.addf %213, %214 : vector<2x8x8xf32>
    %cst_92 = arith.constant dense<0xFF800000> : vector<2x8xf32>
    %216 = vector.multi_reduction <maximumf>, %215, %cst_92 [2] : vector<2x8x8xf32> to vector<2x8xf32>
    %217 = vector.shape_cast %216 : vector<2x8xf32> to vector<2x8x1xf32>
    %218 = vector.broadcast %217 : vector<2x8x1xf32> to vector<2x8x8xf32>
    %219 = arith.subf %215, %218 : vector<2x8x8xf32>
    %220 = math.exp %219 : vector<2x8x8xf32>
    %cst_93 = arith.constant dense<0.000000e+00> : vector<2x8xf32>
    %221 = vector.multi_reduction <add>, %220, %cst_93 [2] : vector<2x8x8xf32> to vector<2x8xf32>
    %222 = vector.shape_cast %221 : vector<2x8xf32> to vector<2x8x1xf32>
    %223 = tpu.reciprocal %222 {approx = true} : vector<2x8x1xf32> -> vector<2x8x1xf32>
    %224 = vector.broadcast %223 : vector<2x8x1xf32> to vector<2x8x8xf32>
    %225 = arith.mulf %220, %224 : vector<2x8x8xf32>
    %226 = vector.extract_strided_slice %210 {offsets = [0, 0, 0], sizes = [2, 8, 8], strides = [1, 1, 1]} : vector<2x8x32xf32> to vector<2x8x8xf32>
    %cst_94 = arith.constant dense<0.000000e+00> : vector<2x8x8xf32>
    %227 = tpu.matmul %225, %226, %cst_94 {dimension_numbers = #tpu.dot_dimension_numbers<[2], [1], [1], [2], [0, 0, 0, 1, 1, 2], [0], [0]>} : vector<2x8x8xf32>, vector<2x8x8xf32>, vector<2x8x8xf32> -> vector<2x8x8xf32>
    %228 = vector.extract_strided_slice %206 {offsets = [0, 0, 8], sizes = [2, 8, 8], strides = [1, 1, 1]} : vector<2x8x32xf32> to vector<2x8x8xf32>
    %229 = vector.extract_strided_slice %208 {offsets = [0, 0, 8], sizes = [2, 8, 8], strides = [1, 1, 1]} : vector<2x8x32xf32> to vector<2x8x8xf32>
    %cst_95 = arith.constant dense<0.000000e+00> : vector<2x8x8xf32>
    %230 = tpu.matmul %228, %229, %cst_95 {dimension_numbers = #tpu.dot_dimension_numbers<[2], [2], [1], [1], [0, 0, 0, 1, 1, 1], [0], [0]>} : vector<2x8x8xf32>, vector<2x8x8xf32>, vector<2x8x8xf32> -> vector<2x8x8xf32>
    %231 = vector.broadcast %23 : vector<2x1x8xf32> to vector<2x8x8xf32>
    %232 = arith.addf %230, %231 : vector<2x8x8xf32>
    %cst_96 = arith.constant dense<0xFF800000> : vector<2x8xf32>
    %233 = vector.multi_reduction <maximumf>, %232, %cst_96 [2] : vector<2x8x8xf32> to vector<2x8xf32>
    %234 = vector.shape_cast %233 : vector<2x8xf32> to vector<2x8x1xf32>
    %235 = vector.broadcast %234 : vector<2x8x1xf32> to vector<2x8x8xf32>
    %236 = arith.subf %232, %235 : vector<2x8x8xf32>
    %237 = math.exp %236 : vector<2x8x8xf32>
    %cst_97 = arith.constant dense<0.000000e+00> : vector<2x8xf32>
    %238 = vector.multi_reduction <add>, %237, %cst_97 [2] : vector<2x8x8xf32> to vector<2x8xf32>
    %239 = vector.shape_cast %238 : vector<2x8xf32> to vector<2x8x1xf32>
    %240 = tpu.reciprocal %239 {approx = true} : vector<2x8x1xf32> -> vector<2x8x1xf32>
    %241 = vector.broadcast %240 : vector<2x8x1xf32> to vector<2x8x8xf32>
    %242 = arith.mulf %237, %241 : vector<2x8x8xf32>
    %243 = vector.extract_strided_slice %210 {offsets = [0, 0, 8], sizes = [2, 8, 8], strides = [1, 1, 1]} : vector<2x8x32xf32> to vector<2x8x8xf32>
    %cst_98 = arith.constant dense<0.000000e+00> : vector<2x8x8xf32>
    %244 = tpu.matmul %242, %243, %cst_98 {dimension_numbers = #tpu.dot_dimension_numbers<[2], [1], [1], [2], [0, 0, 0, 1, 1, 2], [0], [0]>} : vector<2x8x8xf32>, vector<2x8x8xf32>, vector<2x8x8xf32> -> vector<2x8x8xf32>
    %245 = vector.extract_strided_slice %206 {offsets = [0, 0, 16], sizes = [2, 8, 8], strides = [1, 1, 1]} : vector<2x8x32xf32> to vector<2x8x8xf32>
    %246 = vector.extract_strided_slice %208 {offsets = [0, 0, 16], sizes = [2, 8, 8], strides = [1, 1, 1]} : vector<2x8x32xf32> to vector<2x8x8xf32>
    %cst_99 = arith.constant dense<0.000000e+00> : vector<2x8x8xf32>
    %247 = tpu.matmul %245, %246, %cst_99 {dimension_numbers = #tpu.dot_dimension_numbers<[2], [2], [1], [1], [0, 0, 0, 1, 1, 1], [0], [0]>} : vector<2x8x8xf32>, vector<2x8x8xf32>, vector<2x8x8xf32> -> vector<2x8x8xf32>
    %248 = vector.broadcast %23 : vector<2x1x8xf32> to vector<2x8x8xf32>
    %249 = arith.addf %247, %248 : vector<2x8x8xf32>
    %cst_100 = arith.constant dense<0xFF800000> : vector<2x8xf32>
    %250 = vector.multi_reduction <maximumf>, %249, %cst_100 [2] : vector<2x8x8xf32> to vector<2x8xf32>
    %251 = vector.shape_cast %250 : vector<2x8xf32> to vector<2x8x1xf32>
    %252 = vector.broadcast %251 : vector<2x8x1xf32> to vector<2x8x8xf32>
    %253 = arith.subf %249, %252 : vector<2x8x8xf32>
    %254 = math.exp %253 : vector<2x8x8xf32>
    %cst_101 = arith.constant dense<0.000000e+00> : vector<2x8xf32>
    %255 = vector.multi_reduction <add>, %254, %cst_101 [2] : vector<2x8x8xf32> to vector<2x8xf32>
    %256 = vector.shape_cast %255 : vector<2x8xf32> to vector<2x8x1xf32>
    %257 = tpu.reciprocal %256 {approx = true} : vector<2x8x1xf32> -> vector<2x8x1xf32>
    %258 = vector.broadcast %257 : vector<2x8x1xf32> to vector<2x8x8xf32>
    %259 = arith.mulf %254, %258 : vector<2x8x8xf32>
    %260 = vector.extract_strided_slice %210 {offsets = [0, 0, 16], sizes = [2, 8, 8], strides = [1, 1, 1]} : vector<2x8x32xf32> to vector<2x8x8xf32>
    %cst_102 = arith.constant dense<0.000000e+00> : vector<2x8x8xf32>
    %261 = tpu.matmul %259, %260, %cst_102 {dimension_numbers = #tpu.dot_dimension_numbers<[2], [1], [1], [2], [0, 0, 0, 1, 1, 2], [0], [0]>} : vector<2x8x8xf32>, vector<2x8x8xf32>, vector<2x8x8xf32> -> vector<2x8x8xf32>
    %262 = vector.extract_strided_slice %206 {offsets = [0, 0, 24], sizes = [2, 8, 8], strides = [1, 1, 1]} : vector<2x8x32xf32> to vector<2x8x8xf32>
    %263 = vector.extract_strided_slice %208 {offsets = [0, 0, 24], sizes = [2, 8, 8], strides = [1, 1, 1]} : vector<2x8x32xf32> to vector<2x8x8xf32>
    %cst_103 = arith.constant dense<0.000000e+00> : vector<2x8x8xf32>
    %264 = tpu.matmul %262, %263, %cst_103 {dimension_numbers = #tpu.dot_dimension_numbers<[2], [2], [1], [1], [0, 0, 0, 1, 1, 1], [0], [0]>} : vector<2x8x8xf32>, vector<2x8x8xf32>, vector<2x8x8xf32> -> vector<2x8x8xf32>
    %265 = vector.broadcast %23 : vector<2x1x8xf32> to vector<2x8x8xf32>
    %266 = arith.addf %264, %265 : vector<2x8x8xf32>
    %cst_104 = arith.constant dense<0xFF800000> : vector<2x8xf32>
    %267 = vector.multi_reduction <maximumf>, %266, %cst_104 [2] : vector<2x8x8xf32> to vector<2x8xf32>
    %268 = vector.shape_cast %267 : vector<2x8xf32> to vector<2x8x1xf32>
    %269 = vector.broadcast %268 : vector<2x8x1xf32> to vector<2x8x8xf32>
    %270 = arith.subf %266, %269 : vector<2x8x8xf32>
    %271 = math.exp %270 : vector<2x8x8xf32>
    %cst_105 = arith.constant dense<0.000000e+00> : vector<2x8xf32>
    %272 = vector.multi_reduction <add>, %271, %cst_105 [2] : vector<2x8x8xf32> to vector<2x8xf32>
    %273 = vector.shape_cast %272 : vector<2x8xf32> to vector<2x8x1xf32>
    %274 = tpu.reciprocal %273 {approx = true} : vector<2x8x1xf32> -> vector<2x8x1xf32>
    %275 = vector.broadcast %274 : vector<2x8x1xf32> to vector<2x8x8xf32>
    %276 = arith.mulf %271, %275 : vector<2x8x8xf32>
    %277 = vector.extract_strided_slice %210 {offsets = [0, 0, 24], sizes = [2, 8, 8], strides = [1, 1, 1]} : vector<2x8x32xf32> to vector<2x8x8xf32>
    %cst_106 = arith.constant dense<0.000000e+00> : vector<2x8x8xf32>
    %278 = tpu.matmul %276, %277, %cst_106 {dimension_numbers = #tpu.dot_dimension_numbers<[2], [1], [1], [2], [0, 0, 0, 1, 1, 2], [0], [0]>} : vector<2x8x8xf32>, vector<2x8x8xf32>, vector<2x8x8xf32> -> vector<2x8x8xf32>
    %279 = tpu.concatenate %227, %244, %261, %278 in 2 : vector<2x8x8xf32>, vector<2x8x8xf32>, vector<2x8x8xf32>, vector<2x8x8xf32> -> vector<2x8x32xf32>
    %280 = vector.shape_cast %279 : vector<2x8x32xf32> to vector<16x32xf32>
    %281 = arith.truncf %280 : vector<16x32xf32> to vector<16x32xbf16>
    %cst_107 = arith.constant dense<0.000000e+00> : vector<16x32xf32>
    %282 = tpu.matmul %281, %198, %cst_107 {dimension_numbers = #tpu.dot_dimension_numbers<[1], [0], [0], [1], [0, 0, 1, 1], [], []>} : vector<16x32xbf16>, vector<32x32xbf16>, vector<16x32xf32> -> vector<16x32xf32>
    %c1_108 = arith.constant 1 : index
    %c0_109 = arith.constant 0 : index
    %c0_110 = arith.constant 0 : index
    %283 = vector.load %arg8[%c1_108, %c0_109, %c0_110] : memref<2x1x32xf32, #tpu.memory_space<vmem>>, vector<1x1x32xf32>
    %284 = vector.shape_cast %283 : vector<1x1x32xf32> to vector<1x32xf32>
    %285 = vector.broadcast %284 : vector<1x32xf32> to vector<16x32xf32>
    %286 = arith.addf %282, %285 : vector<16x32xf32>
    %287 = arith.addf %286, %194 : vector<16x32xf32>
    %c1_111 = arith.constant 1 : index
    %c0_112 = arith.constant 0 : index
    %c0_113 = arith.constant 0 : index
    %288 = vector.load %arg9[%c1_111, %c0_112, %c0_113] : memref<2x1x32xf32, #tpu.memory_space<vmem>>, vector<1x1x32xf32>
    %289 = vector.shape_cast %288 : vector<1x1x32xf32> to vector<1x32xf32>
    %c1_114 = arith.constant 1 : index
    %c0_115 = arith.constant 0 : index
    %c0_116 = arith.constant 0 : index
    %290 = vector.load %arg10[%c1_114, %c0_115, %c0_116] : memref<2x1x32xf32, #tpu.memory_space<vmem>>, vector<1x1x32xf32>
    %291 = vector.shape_cast %290 : vector<1x1x32xf32> to vector<1x32xf32>
    %cst_117 = arith.constant dense<0.000000e+00> : vector<16xf32>
    %292 = vector.multi_reduction <add>, %287, %cst_117 [1] : vector<16x32xf32> to vector<16xf32>
    %293 = vector.shape_cast %292 : vector<16xf32> to vector<16x1xf32>
    %cst_118 = arith.constant 3.200000e+01 : f32
    %294 = vector.broadcast %cst_118 : f32 to vector<16x1xf32>
    %295 = arith.divf %293, %294 : vector<16x1xf32>
    %296 = vector.broadcast %295 : vector<16x1xf32> to vector<16x32xf32>
    %297 = arith.subf %287, %296 : vector<16x32xf32>
    %298 = arith.mulf %297, %297 : vector<16x32xf32>
    %cst_119 = arith.constant dense<0.000000e+00> : vector<16xf32>
    %299 = vector.multi_reduction <add>, %298, %cst_119 [1] : vector<16x32xf32> to vector<16xf32>
    %300 = vector.shape_cast %299 : vector<16xf32> to vector<16x1xf32>
    %cst_120 = arith.constant 3.200000e+01 : f32
    %301 = vector.broadcast %cst_120 : f32 to vector<16x1xf32>
    %302 = arith.divf %300, %301 : vector<16x1xf32>
    %cst_121 = arith.constant 9.99999996E-13 : f32
    %303 = vector.broadcast %cst_121 : f32 to vector<16x1xf32>
    %304 = arith.addf %302, %303 : vector<16x1xf32>
    %305 = math.rsqrt %304 : vector<16x1xf32>
    %306 = vector.broadcast %305 : vector<16x1xf32> to vector<16x32xf32>
    %307 = arith.mulf %297, %306 : vector<16x32xf32>
    %308 = vector.broadcast %289 : vector<1x32xf32> to vector<16x32xf32>
    %309 = arith.mulf %307, %308 : vector<16x32xf32>
    %310 = vector.broadcast %291 : vector<1x32xf32> to vector<16x32xf32>
    %311 = arith.addf %309, %310 : vector<16x32xf32>
    %312 = arith.truncf %311 : vector<16x32xf32> to vector<16x32xbf16>
    %c1_122 = arith.constant 1 : index
    %c0_123 = arith.constant 0 : index
    %c0_124 = arith.constant 0 : index
    %313 = vector.load %arg11[%c1_122, %c0_123, %c0_124] : memref<2x32x64xbf16, #tpu.memory_space<vmem>>, vector<1x32x64xbf16>
    %314 = vector.shape_cast %313 : vector<1x32x64xbf16> to vector<32x64xbf16>
    %cst_125 = arith.constant dense<0.000000e+00> : vector<16x64xf32>
    %315 = tpu.matmul %312, %314, %cst_125 {dimension_numbers = #tpu.dot_dimension_numbers<[1], [0], [0], [1], [0, 0, 1, 1], [], []>} : vector<16x32xbf16>, vector<32x64xbf16>, vector<16x64xf32> -> vector<16x64xf32>
    %c1_126 = arith.constant 1 : index
    %c0_127 = arith.constant 0 : index
    %c0_128 = arith.constant 0 : index
    %316 = vector.load %arg12[%c1_126, %c0_127, %c0_128] : memref<2x1x64xf32, #tpu.memory_space<vmem>>, vector<1x1x64xf32>
    %317 = vector.shape_cast %316 : vector<1x1x64xf32> to vector<1x64xf32>
    %318 = vector.broadcast %317 : vector<1x64xf32> to vector<16x64xf32>
    %319 = arith.addf %315, %318 : vector<16x64xf32>
    %cst_129 = arith.constant 5.000000e-01 : f32
    %320 = vector.broadcast %cst_129 : f32 to vector<16x64xf32>
    %321 = arith.mulf %320, %319 : vector<16x64xf32>
    %cst_130 = arith.constant 4.471500e-02 : f32
    %322 = vector.broadcast %cst_130 : f32 to vector<16x64xf32>
    %323 = arith.mulf %322, %319 : vector<16x64xf32>
    %324 = arith.mulf %323, %319 : vector<16x64xf32>
    %325 = arith.mulf %324, %319 : vector<16x64xf32>
    %326 = arith.addf %319, %325 : vector<16x64xf32>
    %cst_131 = arith.constant 0.797884583 : f32
    %327 = vector.broadcast %cst_131 : f32 to vector<16x64xf32>
    %328 = arith.mulf %327, %326 : vector<16x64xf32>
    %329 = math.tanh %328 : vector<16x64xf32>
    %cst_132 = arith.constant 1.000000e+00 : f32
    %330 = vector.broadcast %cst_132 : f32 to vector<16x64xf32>
    %331 = arith.addf %330, %329 : vector<16x64xf32>
    %332 = arith.mulf %321, %331 : vector<16x64xf32>
    %333 = arith.truncf %332 : vector<16x64xf32> to vector<16x64xbf16>
    %c1_133 = arith.constant 1 : index
    %c0_134 = arith.constant 0 : index
    %c0_135 = arith.constant 0 : index
    %334 = vector.load %arg13[%c1_133, %c0_134, %c0_135] : memref<2x64x32xbf16, #tpu.memory_space<vmem>>, vector<1x64x32xbf16>
    %335 = vector.shape_cast %334 : vector<1x64x32xbf16> to vector<64x32xbf16>
    %cst_136 = arith.constant dense<0.000000e+00> : vector<16x32xf32>
    %336 = tpu.matmul %333, %335, %cst_136 {dimension_numbers = #tpu.dot_dimension_numbers<[1], [0], [0], [1], [0, 0, 1, 1], [], []>} : vector<16x64xbf16>, vector<64x32xbf16>, vector<16x32xf32> -> vector<16x32xf32>
    %c1_137 = arith.constant 1 : index
    %c0_138 = arith.constant 0 : index
    %c0_139 = arith.constant 0 : index
    %337 = vector.load %arg14[%c1_137, %c0_138, %c0_139] : memref<2x1x32xf32, #tpu.memory_space<vmem>>, vector<1x1x32xf32>
    %338 = vector.shape_cast %337 : vector<1x1x32xf32> to vector<1x32xf32>
    %339 = vector.broadcast %338 : vector<1x32xf32> to vector<16x32xf32>
    %340 = arith.addf %336, %339 : vector<16x32xf32>
    %341 = arith.addf %340, %311 : vector<16x32xf32>
    %c1_140 = arith.constant 1 : index
    %c0_141 = arith.constant 0 : index
    %c0_142 = arith.constant 0 : index
    %342 = vector.load %arg15[%c1_140, %c0_141, %c0_142] : memref<2x1x32xf32, #tpu.memory_space<vmem>>, vector<1x1x32xf32>
    %343 = vector.shape_cast %342 : vector<1x1x32xf32> to vector<1x32xf32>
    %c1_143 = arith.constant 1 : index
    %c0_144 = arith.constant 0 : index
    %c0_145 = arith.constant 0 : index
    %344 = vector.load %arg16[%c1_143, %c0_144, %c0_145] : memref<2x1x32xf32, #tpu.memory_space<vmem>>, vector<1x1x32xf32>
    %345 = vector.shape_cast %344 : vector<1x1x32xf32> to vector<1x32xf32>
    %cst_146 = arith.constant dense<0.000000e+00> : vector<16xf32>
    %346 = vector.multi_reduction <add>, %341, %cst_146 [1] : vector<16x32xf32> to vector<16xf32>
    %347 = vector.shape_cast %346 : vector<16xf32> to vector<16x1xf32>
    %cst_147 = arith.constant 3.200000e+01 : f32
    %348 = vector.broadcast %cst_147 : f32 to vector<16x1xf32>
    %349 = arith.divf %347, %348 : vector<16x1xf32>
    %350 = vector.broadcast %349 : vector<16x1xf32> to vector<16x32xf32>
    %351 = arith.subf %341, %350 : vector<16x32xf32>
    %352 = arith.mulf %351, %351 : vector<16x32xf32>
    %cst_148 = arith.constant dense<0.000000e+00> : vector<16xf32>
    %353 = vector.multi_reduction <add>, %352, %cst_148 [1] : vector<16x32xf32> to vector<16xf32>
    %354 = vector.shape_cast %353 : vector<16xf32> to vector<16x1xf32>
    %cst_149 = arith.constant 3.200000e+01 : f32
    %355 = vector.broadcast %cst_149 : f32 to vector<16x1xf32>
    %356 = arith.divf %354, %355 : vector<16x1xf32>
    %cst_150 = arith.constant 9.99999996E-13 : f32
    %357 = vector.broadcast %cst_150 : f32 to vector<16x1xf32>
    %358 = arith.addf %356, %357 : vector<16x1xf32>
    %359 = math.rsqrt %358 : vector<16x1xf32>
    %360 = vector.broadcast %359 : vector<16x1xf32> to vector<16x32xf32>
    %361 = arith.mulf %351, %360 : vector<16x32xf32>
    %362 = vector.broadcast %343 : vector<1x32xf32> to vector<16x32xf32>
    %363 = arith.mulf %361, %362 : vector<16x32xf32>
    %364 = vector.broadcast %345 : vector<1x32xf32> to vector<16x32xf32>
    %365 = arith.addf %363, %364 : vector<16x32xf32>
    %c0_151 = arith.constant 0 : index
    %c0_152 = arith.constant 0 : index
    %366 = vector.load %arg17[%c0_151, %c0_152] : memref<16x32xf32, #tpu.memory_space<vmem>>, vector<16x32xf32>
    tpu.vector_store %arg17[%c0_151, %c0_152], %365 {strides = array<i32>} : memref<16x32xf32, #tpu.memory_space<vmem>>, vector<16x32xf32>,
    return
  }
  func.func @transform_0(%arg0: i32) -> (i32, i32) {
    %c0_i32 = arith.constant 0 : i32
    %c0_i32_0 = arith.constant 0 : i32
    return %arg0, %c0_i32 : i32, i32
  }
  func.func @transform_1(%arg0: i32) -> (i32, i32, i32) {
    %c0_i32 = arith.constant 0 : i32
    %c0_i32_0 = arith.constant 0 : i32
    %c0_i32_1 = arith.constant 0 : i32
    return %arg0, %c0_i32, %c0_i32_0 : i32, i32, i32
  }
  func.func @transform_2(%arg0: i32) -> (i32, i32) {
    %c0_i32 = arith.constant 0 : i32
    %c0_i32_0 = arith.constant 0 : i32
    %c0_i32_1 = arith.constant 0 : i32
    return %c0_i32, %c0_i32_0 : i32, i32
  }
  func.func @transform_3(%arg0: i32) -> (i32, i32) {
    %c0_i32 = arith.constant 0 : i32
    %c0_i32_0 = arith.constant 0 : i32
    %c0_i32_1 = arith.constant 0 : i32
    return %c0_i32, %c0_i32_0 : i32, i32
  }
  func.func @transform_4(%arg0: i32) -> (i32, i32, i32) {
    %c0_i32 = arith.constant 0 : i32
    %c0_i32_0 = arith.constant 0 : i32
    %c0_i32_1 = arith.constant 0 : i32
    %c0_i32_2 = arith.constant 0 : i32
    return %c0_i32, %c0_i32_0, %c0_i32_1 : i32, i32, i32
  }
  func.func @transform_5(%arg0: i32) -> (i32, i32, i32) {
    %c0_i32 = arith.constant 0 : i32
    %c0_i32_0 = arith.constant 0 : i32
    %c0_i32_1 = arith.constant 0 : i32
    %c0_i32_2 = arith.constant 0 : i32
    return %c0_i32, %c0_i32_0, %c0_i32_1 : i32, i32, i32
  }
  func.func @transform_6(%arg0: i32) -> (i32, i32, i32) {
    %c0_i32 = arith.constant 0 : i32
    %c0_i32_0 = arith.constant 0 : i32
    %c0_i32_1 = arith.constant 0 : i32
    %c0_i32_2 = arith.constant 0 : i32
    return %c0_i32, %c0_i32_0, %c0_i32_1 : i32, i32, i32
  }
  func.func @transform_7(%arg0: i32) -> (i32, i32, i32) {
    %c0_i32 = arith.constant 0 : i32
    %c0_i32_0 = arith.constant 0 : i32
    %c0_i32_1 = arith.constant 0 : i32
    %c0_i32_2 = arith.constant 0 : i32
    return %c0_i32, %c0_i32_0, %c0_i32_1 : i32, i32, i32
  }
  func.func @transform_8(%arg0: i32) -> (i32, i32, i32) {
    %c0_i32 = arith.constant 0 : i32
    %c0_i32_0 = arith.constant 0 : i32
    %c0_i32_1 = arith.constant 0 : i32
    %c0_i32_2 = arith.constant 0 : i32
    return %c0_i32, %c0_i32_0, %c0_i32_1 : i32, i32, i32
  }
  func.func @transform_9(%arg0: i32) -> (i32, i32, i32) {
    %c0_i32 = arith.constant 0 : i32
    %c0_i32_0 = arith.constant 0 : i32
    %c0_i32_1 = arith.constant 0 : i32
    %c0_i32_2 = arith.constant 0 : i32
    return %c0_i32, %c0_i32_0, %c0_i32_1 : i32, i32, i32
  }
  func.func @transform_10(%arg0: i32) -> (i32, i32, i32) {
    %c0_i32 = arith.constant 0 : i32
    %c0_i32_0 = arith.constant 0 : i32
    %c0_i32_1 = arith.constant 0 : i32
    %c0_i32_2 = arith.constant 0 : i32
    return %c0_i32, %c0_i32_0, %c0_i32_1 : i32, i32, i32
  }
  func.func @transform_11(%arg0: i32) -> (i32, i32, i32) {
    %c0_i32 = arith.constant 0 : i32
    %c0_i32_0 = arith.constant 0 : i32
    %c0_i32_1 = arith.constant 0 : i32
    %c0_i32_2 = arith.constant 0 : i32
    return %c0_i32, %c0_i32_0, %c0_i32_1 : i32, i32, i32
  }
  func.func @transform_12(%arg0: i32) -> (i32, i32, i32) {
    %c0_i32 = arith.constant 0 : i32
    %c0_i32_0 = arith.constant 0 : i32
    %c0_i32_1 = arith.constant 0 : i32
    %c0_i32_2 = arith.constant 0 : i32
    return %c0_i32, %c0_i32_0, %c0_i32_1 : i32, i32, i32
  }
  func.func @transform_13(%arg0: i32) -> (i32, i32, i32) {
    %c0_i32 = arith.constant 0 : i32
    %c0_i32_0 = arith.constant 0 : i32
    %c0_i32_1 = arith.constant 0 : i32
    %c0_i32_2 = arith.constant 0 : i32
    return %c0_i32, %c0_i32_0, %c0_i32_1 : i32, i32, i32
  }
  func.func @transform_14(%arg0: i32) -> (i32, i32, i32) {
    %c0_i32 = arith.constant 0 : i32
    %c0_i32_0 = arith.constant 0 : i32
    %c0_i32_1 = arith.constant 0 : i32
    %c0_i32_2 = arith.constant 0 : i32
    return %c0_i32, %c0_i32_0, %c0_i32_1 : i32, i32, i32
  }
  func.func @transform_15(%arg0: i32) -> (i32, i32, i32) {
    %c0_i32 = arith.constant 0 : i32
    %c0_i32_0 = arith.constant 0 : i32
    %c0_i32_1 = arith.constant 0 : i32
    %c0_i32_2 = arith.constant 0 : i32
    return %c0_i32, %c0_i32_0, %c0_i32_1 : i32, i32, i32
  }
  func.func @transform_16(%arg0: i32) -> (i32, i32) {
    %c0_i32 = arith.constant 0 : i32
    %c0_i32_0 = arith.constant 0 : i32
    return %arg0, %c0_i32 : i32, i32
  }
}

</mosaic_0001>

<bundles_post_ra>
// kernel: _annotate.1
= control target key start
LH: loop header
LB: loop body
LE: loop exit
PB: predicated region body
PF: predicated region fallthrough
CT: control target
= control target key end

     0   :  { %vm58_vm0 = vcmask 261120   ;;  %v4238_v14 = vmov 0.0   ;;  %vm4239_vm1 = vmmov 0   ;;  %vm191_vm2 = vcmask 64512   ;;  %s4241_s24 = smov 64   ;;  %s4242_s25 = smov 88   ;;  %s4907_s0 = inlined_call_operand.vmem [shape: f32[16,32], index: 0, kind: input, shape index: {}]   ;;  %s4908_s4 = inlined_call_operand.vmem [shape: bf16[2,32,96], index: 4, kind: input, shape index: {}]   ;;  %s4909_s2 = inlined_call_operand.vmem [shape: f32[1,32], index: 2, kind: input, shape index: {}]   ;;  %s4910_s3 = inlined_call_operand.vmem [shape: f32[1,32], index: 3, kind: input, shape index: {}]   ;;  %s4911_s5 = inlined_call_operand.vmem [shape: f32[2,1,96], index: 5, kind: input, shape index: {}]   ;;  %s4912_s1 = inlined_call_operand.vmem [shape: f32[2,1,8], index: 1, kind: input, shape index: {}]   ;;  %s4913_s6 = inlined_call_operand.vmem [shape: bf16[2,32,32], index: 6, kind: input, shape index: {}]   ;;  %s4914_s7 = inlined_call_operand.vmem [shape: f32[2,1,32], index: 7, kind: input, shape index: {}]   ;;  %s4915_s10 = inlined_call_operand.vmem [shape: bf16[2,32,64], index: 10, kind: input, shape index: {}]   ;;  %s4916_s8 = inlined_call_operand.vmem [shape: f32[2,1,32], index: 8, kind: input, shape index: {}]   ;;  %s4917_s9 = inlined_call_operand.vmem [shape: f32[2,1,32], index: 9, kind: input, shape index: {}]   ;;  %s4918_s12 = inlined_call_operand.vmem [shape: bf16[2,64,32], index: 12, kind: input, shape index: {}]   ;;  %s4919_s11 = inlined_call_operand.vmem [shape: f32[2,1,64], index: 11, kind: input, shape index: {}]   ;;  %s4920_s13 = inlined_call_operand.vmem [shape: f32[2,1,32], index: 13, kind: input, shape index: {}]   ;;  %s4921_s14 = inlined_call_operand.vmem [shape: f32[2,1,32], index: 14, kind: input, shape index: {}]   ;;  %s4922_s15 = inlined_call_operand.vmem [shape: f32[2,1,32], index: 15, kind: input, shape index: {}]   ;;  %s4923_s16 = inlined_call_operand.vmem [shape: f32[16,32], index: 16, kind: output, shape index: {}]  }
   0x1   :  { %4932 = sst [smem:[#allocation2_spill]] %s4907_s0  ;;  %3846 = vmatprep.subr.bf16.mxu0 %v4238_v14  ;;  %v4124_v15 = vld [vmem:[%s4908_s4] sm:$0xff]   ;;  %3850 = vmatprep.mubr.msk.bf16.mxu0 %vm4239_vm1, %v4238_v14  ;;  %v4125_v16 = vld [vmem:[%s4908_s4 + $0x8] sm:$0xff]   ;;  %s4243_s26 = smov 120   ;;  %vm1533_vm3 = vcmask 130048   ;;  %vm1536_vm4 = vcmask 195584  }
   0x2   :  { %s4933_s23 = sld [smem:[#allocation2_spill]]  ;;  %3859 = vmatprep.subr.mxu1 %v4238_v14  ;;  %3861 = vmatprep.mubr.msk.f32.mxu1 %vm4239_vm1, %v4238_v14  ;;  %v3630_v25 = vld [vmem:[%s4909_s2] ss:$0 sm:$0xff]  ;;  %v4409_v45 = vld [vmem:[%s4912_s1 + $0x1] ss:$0 sm:$0xff]  ;;  %s4244_s27 = smov 56  }
   0x3   :  { %3847 = vmatpush3.bf16.msra.mxu0 %v4124_v15  ;;  %v3631_v29 = vld [vmem:[%s4910_s3] ss:$0 sm:$0xff]  ;;  %s4240_s3 = smov 96   ;;  %s4245_s28 = smov 80   ;;  %vm1775_vm5 = vcmask 523264  }
   0x4   :  { %3848 = vmatprep.subr.bf16.mxu0 %v4238_v14  ;;  %v3632_v34 = vld [vmem:[%s4911_s5] ss:$0 sm:$0xff]  ;;  %s4246_s29 = smov 112   ;;  %s4247_s30 = smov 48  }
   0x5   :  { %v4404_v43 = vld [vmem:[%s4912_s1] ss:$0 sm:$0xff]  ;;  %s4248_s0 = smov 72   ;;  %s4930_s17 = smov 104  }
   0x6   :  { %s4928_s18 = smov 40   ;;  %s4927_s2 = smov 8  }
   0x7   :  { %3849 = vmatpush3.bf16.msra.mxu0 %v4125_v16  ;;  %s4925_s19 = smov 16   ;;  %s4938_s20 = smov 24  }
   0x8   :  { %v54_v0 = vld [vmem:[%s4933_s23] sm:$0xff]  ;;  %v55_v1 = vld [vmem:[%s4933_s23 + $0x8] sm:$0xff]  ;;  %3854 = vmatprep.subr.mxu0 %v4238_v14 }
   0x9   :  { %v59_v2 = vsel %vm58_vm0, %v54_v0, 0.0  ;;  %v62_v3 = vsel %vm58_vm0, %v55_v1, 0.0 }
   0xa   :  { %60 = vadd.xlane.f32.xlu0 %v59_v2 }
   0xe   :  { %63 = vadd.xlane.f32.xlu0 %v62_v3 }
  0x97   :  { %v61_v4 = vpop.xlane.xlu0 %60 }
  0x98   :  { %v66_v5 = vmul.f32 0.03125, %v61_v4 }
  0x9a   :  { %v68_v6 = vsub.f32 %v54_v0, %v66_v5 }
  0x9b   :  { %v64_v7 = vpop.xlane.xlu0 %63 }
  0x9c   :  { %v67_v8 = vmul.f32 0.03125, %v64_v7  ;;  %v70_v9 = vmul.f32 %v68_v6, %v68_v6 }
  0x9e   :  { %v69_v10 = vsub.f32 %v55_v1, %v67_v8  ;;  %v72_v11 = vsel %vm58_vm0, %v70_v9, 0.0 }
  0x9f   :  { %73 = vadd.xlane.f32.xlu1 %v72_v11 }
  0xa0   :  { %v71_v12 = vmul.f32 %v69_v10, %v69_v10 }
  0xa2   :  { %v75_v13 = vsel %vm58_vm0, %v71_v12, 0.0 }
  0xa3   :  { %76 = vadd.xlane.f32.xlu1 %v75_v13 }
 0x12c   :  { %v74_v17 = vpop.xlane.xlu1 %73 }
 0x12d   :  { %v78_v18 = vmul.f32 0.03125, %v74_v17 }
 0x12f   :  { %v80_v19 = vadd.f32 1e-12, %v78_v18 }
 0x130   :  { %v77_v20 = vpop.xlane.xlu1 %76 }
 0x131   :  { %4144 = vrsqrt.f32 %v80_v19  ;;  %v79_v21 = vmul.f32 0.03125, %v77_v20 }
 0x133   :  { %v81_v22 = vadd.f32 1e-12, %v79_v21 }
 0x135   :  { %4146 = vrsqrt.f32 %v81_v22 }
 0x13b   :  { %v4145_v23 = vpop.eup %4144 }
 0x13c   :  { %v84_v24 = vmul.f32 %v4145_v23, %v68_v6 }
 0x13e   :  { %v92_v28 = vmul.f32 %v3630_v25, %v84_v24 }
 0x13f   :  { %v4147_v26 = vpop.eup %4146 }
 0x140   :  { %v85_v27 = vmul.f32 %v4147_v26, %v69_v10  ;;  %v4369_v31 = vadd.f32 %v3631_v29, %v92_v28 }
 0x142   :  { %v93_v30 = vmul.f32 %v3630_v25, %v85_v27 }
 0x144   :  { %v4371_v32 = vadd.f32 %v3631_v29, %v93_v30 }
 0x146   :  { %v112_v33 = vpack.c.bf16 %v4371_v32, %v4369_v31 }
 0x148   :  { %3851 = vmatmul.mubr.msk.bf16.vlgmr.msra.gmra.mrb[0].mxu0 %vm58_vm0, %v112_v33 }
 0x149   :  { %3856 = vmatprep.mubr.msk.f32.mxu0 %vm4239_vm1, %v4238_v14 }
 0x21b   :  { %v169_v35 = vpop.f32.mrb[0].mxu0 }
 0x21c   :  { %v4381_v36 = vadd.f32 %v3632_v34, %v169_v35  ;;  %v3852_v37 = vpop.f32.mrb[1].mxu0 }
 0x21d   :  { %v172_v38 = vpop.f32.mrb[2].mxu0 }
 0x21e   :  { %v4383_v39 = vadd.f32 %v3632_v34, %v172_v38  ;;  %189 = vrot.lane.b32.xlu0 %v4381_v36, %s4240_s3  ;;  %v3853_v40 = vpop.f32.mrb[3].mxu0 }
 0x220   :  { %267 = vrot.lane.b32.xlu1 %v4383_v39, %s4240_s3 }
 0x290   :  { %v190_v41 = vpop.permute.xlu0 %189 }
 0x291   :  { %3855 = vmatpush3.xpose.msk.msra.mxu0 %vm191_vm2, %v190_v41 }
 0x292   :  { %v268_v42 = vpop.permute.xlu1 %267  ;;  %3869 = vmatprep.subr.mxu0 %v4238_v14 }
 0x293   :  { %3860 = vmatpush3.xpose.msk.msra.mxu1 %vm191_vm2, %v268_v42 }
 0x294   :  { %3857 = vmatmul.mubr.msk.f32.vlgmr.msra.gmra.mrb[4].mxu0 %vm191_vm2, %v4381_v36  ;;  %3864 = vmatprep.subr.mxu1 %v4238_v14 }
 0x295   :  { %3871 = vmatprep.mubr.msk.f32.mxu0 %vm4239_vm1, %v4238_v14 }
 0x296   :  { %3862 = vmatmul.mubr.msk.f32.vlgmr.msra.gmra.mrb[0].mxu1 %vm191_vm2, %v4383_v39 }
 0x297   :  { %3866 = vmatprep.mubr.msk.f32.mxu1 %vm4239_vm1, %v4238_v14 }
 0x367   :  { %v262_v44 = vpop.f32.mrb[4].mxu0 }
 0x368   :  { %v263_v46 = vadd.f32 %v4404_v43, %v262_v44  ;;  %v3858_v47 = vpop.f32.mrb[5].mxu0 }
 0x369   :  { %v339_v48 = vpop.f32.mrb[0].mxu1 }
 0x36a   :  { %v340_v49 = vadd.f32 %v4409_v45, %v339_v48  ;;  %v3863_v50 = vpop.f32.mrb[1].mxu1  ;;  %v343_v51 = vsel %vm191_vm2, %v263_v46, -inf }
 0x36b   :  { %344 = vmax.xlane.f32.xlu1 %v343_v51 }
 0x36c   :  { %v346_v52 = vsel %vm191_vm2, %v340_v49, -inf }
 0x36d   :  { %347 = vmax.xlane.f32.xlu0 %v346_v52 }
 0x37c   :  { %441 = vrot.lane.b32.xlu1 %v4383_v39, %s4241_s24 }
 0x380   :  { %519 = vrot.lane.b32.xlu1 %v4381_v36, %s4242_s25 }
 0x383   :  { %365 = vrot.lane.b32.xlu0 %v4381_v36, %s4241_s24 }
 0x384   :  { %597 = vrot.lane.b32.xlu1 %v4383_v39, %s4242_s25 }
 0x3f8   :  { %v345_v53 = vpop.xlane.xlu1 %344 }
 0x3f9   :  { %v349_v54 = vsub.f32 %v263_v46, %v345_v53 }
 0x3fa   :  { %v348_v55 = vpop.xlane.xlu0 %347 }
 0x3fb   :  { %v351_v56 = vmul.f32 1.442695, %v349_v54  ;;  %v350_v57 = vsub.f32 %v340_v49, %v348_v55 }
 0x3fc   :  { %v442_v58 = vpop.permute.xlu1 %441 }
 0x3fd   :  { %4148 = vpow2.f32 %v351_v56  ;;  %v353_v59 = vmul.f32 1.442695, %v350_v57  ;;  %3870 = vmatpush3.msra.mxu0 %v442_v58 }
 0x3fe   :  { %v366_v60 = vpop.permute.xlu0 %365  ;;  %3879 = vmatprep.subr.mxu0 %v4238_v14 }
 0x3ff   :  { %4150 = vpow2.f32 %v353_v59  ;;  %3865 = vmatpush3.msra.mxu1 %v366_v60 }
 0x400   :  { %3874 = vmatprep.subr.mxu1 %v4238_v14  ;;  %v520_v1 = vpop.permute.xlu1 %519 }
 0x404   :  { %v598_v2 = vpop.permute.xlu1 %597 }
 0x407   :  { %v4149_v61 = vpop.eup %4148 }
 0x408   :  { %v355_v62 = vsel %vm191_vm2, %v4149_v61, 0.0 }
 0x409   :  { %v4151_v63 = vpop.eup %4150  ;;  %356 = vadd.xlane.f32.xlu0 %v355_v62 }
 0x40a   :  { %v358_v0 = vsel %vm191_vm2, %v4151_v63, 0.0 }
 0x40b   :  { %359 = vadd.xlane.f32.xlu1 %v358_v0 }
 0x41c   :  { %595 = vrot.lane.b32.xlu1 %v4383_v39, %s4243_s26 }
 0x41f   :  { %517 = vrot.lane.b32.xlu0 %v4381_v36, %s4243_s26 }
 0x496   :  { %v357_v3 = vpop.xlane.xlu0 %356 }
 0x497   :  { %4152 = vrcp.f32 %v357_v3 }
 0x498   :  { %v360_v4 = vpop.xlane.xlu1 %359 }
 0x499   :  { %4154 = vrcp.f32 %v360_v4 }
 0x49a   :  { %v518_v9 = vpop.permute.xlu0 %517 }
 0x49c   :  { %v596_v10 = vpop.permute.xlu1 %595 }
 0x4a1   :  { %v4153_v5 = vpop.eup %4152 }
 0x4a2   :  { %v363_v6 = vmul.f32 %v4153_v5, %v4149_v61 }
 0x4a3   :  { %v4155_v7 = vpop.eup %4154 }
 0x4a4   :  { %v364_v8 = vmul.f32 %v4155_v7, %v4151_v63  ;;  %3867 = vmatmul.mubr.msk.f32.vlgmr.msra.gmra.mrb[2].mxu1 %vm191_vm2, %v363_v6 }
 0x4a5   :  { %3875 = vmatpush3.xpose.msk.msra.mxu1 %vm191_vm2, %v520_v1  ;;  %3876 = vmatprep.mubr.msk.f32.mxu1 %vm4239_vm1, %v4238_v14 }
 0x4a6   :  { %3872 = vmatmul.mubr.msk.f32.vlgmr.msra.gmra.mrb[6].mxu0 %vm191_vm2, %v364_v8  ;;  %3884 = vmatprep.subr.mxu1 %v4238_v14 }
 0x4a7   :  { %3880 = vmatpush3.xpose.msk.msra.mxu0 %vm191_vm2, %v598_v2  ;;  %3881 = vmatprep.mubr.msk.f32.mxu0 %vm4239_vm1, %v4238_v14 }
 0x4a8   :  { %3877 = vmatmul.mubr.msk.f32.vlgmr.msra.gmra.mrb[4].mxu1 %vm191_vm2, %v518_v9  ;;  %3889 = vmatprep.subr.mxu0 %v4238_v14 }
 0x4a9   :  { %3886 = vmatprep.mubr.msk.f32.mxu1 %vm4239_vm1, %v4238_v14 }
 0x4aa   :  { %3882 = vmatmul.mubr.msk.f32.vlgmr.msra.gmra.mrb[8].mxu0 %vm191_vm2, %v596_v10 }
 0x4ab   :  { %3891 = vmatprep.mubr.msk.f32.mxu0 %vm4239_vm1, %v4238_v14 }
 0x577   :  { %v4447_v11 = vpop.f32.mrb[2].mxu1 }
 0x578   :  { %v3868_v12 = vpop.f32.mrb[3].mxu1 }
 0x579   :  { %v4449_v13 = vpop.f32.mrb[6].mxu0 }
 0x57a   :  { %v3873_v15 = vpop.f32.mrb[7].mxu0 }
 0x57b   :  { %v591_v16 = vpop.f32.mrb[4].mxu1 }
 0x57c   :  { %v592_v17 = vadd.f32 %v4404_v43, %v591_v16  ;;  %v3878_v18 = vpop.f32.mrb[5].mxu1 }
 0x57d   :  { %v669_v19 = vpop.f32.mrb[8].mxu0 }
 0x57e   :  { %v670_v20 = vadd.f32 %v4409_v45, %v669_v19  ;;  %v3883_v21 = vpop.f32.mrb[9].mxu0  ;;  %v673_v22 = vsel %vm191_vm2, %v592_v17, -inf }
 0x57f   :  { %674 = vmax.xlane.f32.xlu0 %v673_v22 }
 0x580   :  { %v676_v23 = vsel %vm191_vm2, %v670_v20, -inf }
 0x581   :  { %677 = vmax.xlane.f32.xlu1 %v676_v23 }
 0x592   :  { %771 = vrot.lane.b32.xlu1 %v4383_v39, %s4244_s27 }
 0x595   :  { %695 = vrot.lane.b32.xlu0 %v4381_v36, %s4244_s27 }
 0x596   :  { %849 = vrot.lane.b32.xlu1 %v4381_v36, %s4245_s28 }
 0x59a   :  { %927 = vrot.lane.b32.xlu1 %v4383_v39, %s4245_s28 }
 0x59e   :  { %925 = vrot.lane.b32.xlu1 %v4383_v39, %s4246_s29 }
 0x60c   :  { %v675_v24 = vpop.xlane.xlu0 %674 }
 0x60d   :  { %v679_v25 = vsub.f32 %v592_v17, %v675_v24 }
 0x60e   :  { %v678_v26 = vpop.xlane.xlu1 %677 }
 0x60f   :  { %v681_v27 = vmul.f32 1.442695, %v679_v25  ;;  %v680_v28 = vsub.f32 %v670_v20, %v678_v26 }
 0x610   :  { %v696_v29 = vpop.permute.xlu0 %695 }
 0x611   :  { %4156 = vpow2.f32 %v681_v27  ;;  %v683_v30 = vmul.f32 1.442695, %v680_v28  ;;  %3885 = vmatpush3.msra.mxu1 %v696_v29 }
 0x612   :  { %v772_v33 = vpop.permute.xlu1 %771  ;;  %3894 = vmatprep.subr.mxu1 %v4238_v14 }
 0x613   :  { %4158 = vpow2.f32 %v683_v30  ;;  %3890 = vmatpush3.msra.mxu0 %v772_v33 }
 0x614   :  { %3899 = vmatprep.subr.mxu0 %v4238_v14 }
 0x616   :  { %v850_v42 = vpop.permute.xlu1 %849 }
 0x61a   :  { %v928_v48 = vpop.permute.xlu1 %927 }
 0x61b   :  { %v4157_v34 = vpop.eup %4156 }
 0x61c   :  { %v685_v35 = vsel %vm191_vm2, %v4157_v34, 0.0 }
 0x61d   :  { %v4159_v37 = vpop.eup %4158  ;;  %686 = vadd.xlane.f32.xlu0 %v685_v35 }
 0x61e   :  { %v688_v38 = vsel %vm191_vm2, %v4159_v37, 0.0  ;;  %v926_v51 = vpop.permute.xlu1 %925 }
 0x621   :  { %689 = vadd.xlane.f32.xlu0 %v688_v38 }
 0x637   :  { %847 = vrot.lane.b32.xlu0 %v4381_v36, %s4246_s29 }
 0x6aa   :  { %v687_v40 = vpop.xlane.xlu0 %686 }
 0x6ab   :  { %4160 = vrcp.f32 %v687_v40 }
 0x6ae   :  { %v690_v41 = vpop.xlane.xlu0 %689 }
 0x6af   :  { %4162 = vrcp.f32 %v690_v41 }
 0x6b2   :  { %v848_v50 = vpop.permute.xlu0 %847 }
 0x6b5   :  { %v4161_v44 = vpop.eup %4160 }
 0x6b6   :  { %v693_v46 = vmul.f32 %v4161_v44, %v4157_v34 }
 0x6b8   :  { %3887 = vmatmul.mubr.msk.f32.vlgmr.msra.gmra.mrb[6].mxu1 %vm191_vm2, %v693_v46 }
 0x6b9   :  { %v4163_v47 = vpop.eup %4162  ;;  %3895 = vmatpush3.xpose.msk.msra.mxu1 %vm191_vm2, %v850_v42  ;;  %3896 = vmatprep.mubr.msk.f32.mxu1 %vm4239_vm1, %v4238_v14 }
 0x6ba   :  { %v694_v49 = vmul.f32 %v4163_v47, %v4159_v37  ;;  %3904 = vmatprep.subr.mxu1 %v4238_v14 }
 0x6bc   :  { %3892 = vmatmul.mubr.msk.f32.vlgmr.msra.gmra.mrb[10].mxu0 %vm191_vm2, %v694_v49  ;;  %3897 = vmatmul.mubr.msk.f32.vlgmr.msra.gmra.mrb[8].mxu1 %vm191_vm2, %v848_v50 }
 0x6bd   :  { %3900 = vmatpush3.xpose.msk.msra.mxu0 %vm191_vm2, %v928_v48  ;;  %3901 = vmatprep.mubr.msk.f32.mxu0 %vm4239_vm1, %v4238_v14 }
 0x6be   :  { %3909 = vmatprep.subr.mxu0 %v4238_v14  ;;  %3906 = vmatprep.mubr.msk.f32.mxu1 %vm4239_vm1, %v4238_v14 }
 0x6c0   :  { %3902 = vmatmul.mubr.msk.f32.vlgmr.msra.gmra.mrb[12].mxu0 %vm191_vm2, %v926_v51 }
 0x6c1   :  { %3911 = vmatprep.mubr.msk.f32.mxu0 %vm4239_vm1, %v4238_v14 }
 0x78b   :  { %v4487_v52 = vpop.f32.mrb[6].mxu1 }
 0x78c   :  { %v3888_v53 = vpop.f32.mrb[7].mxu1 }
 0x78f   :  { %v4489_v54 = vpop.f32.mrb[10].mxu0  ;;  %v921_v55 = vpop.f32.mrb[8].mxu1 }
 0x790   :  { %v4094_v56 = vpack.i.bf16 %v4489_v54, %v4487_v52  ;;  %v922_v57 = vadd.f32 %v4404_v43, %v921_v55  ;;  %v3893_v58 = vpop.f32.mrb[11].mxu0  ;;  %v3898_v59 = vpop.f32.mrb[9].mxu1 }
 0x792   :  { %v1003_v60 = vsel %vm191_vm2, %v922_v57, -inf }
 0x793   :  { %1004 = vmax.xlane.f32.xlu0 %v1003_v60  ;;  %v999_v61 = vpop.f32.mrb[12].mxu0 }
 0x794   :  { %v1000_v62 = vadd.f32 %v4409_v45, %v999_v61  ;;  %v3903_v63 = vpop.f32.mrb[13].mxu0 }
 0x796   :  { %v1006_v0 = vsel %vm191_vm2, %v1000_v62, -inf }
 0x797   :  { %1007 = vmax.xlane.f32.xlu1 %v1006_v0 }
 0x7a8   :  { %1101 = vrot.lane.b32.xlu1 %v4383_v39, %s4247_s30 }
 0x7a9   :  { %1025 = vrot.lane.b32.xlu0 %v4381_v36, %s4247_s30 }
 0x7ac   :  { %1179 = vrot.lane.b32.xlu1 %v4381_v36, %s4248_s0 }
 0x7b0   :  { %1257 = vrot.lane.b32.xlu1 %v4383_v39, %s4248_s0 }
 0x7b4   :  { %1255 = vrot.lane.b32.xlu1 %v4383_v39, %s4930_s17 }
 0x820   :  { %v1005_v1 = vpop.xlane.xlu0 %1004 }
 0x821   :  { %v1009_v2 = vsub.f32 %v922_v57, %v1005_v1 }
 0x823   :  { %v1011_v3 = vmul.f32 1.442695, %v1009_v2 }
 0x824   :  { %v1026_v4 = vpop.permute.xlu0 %1025  ;;  %v1008_v5 = vpop.xlane.xlu1 %1007 }
 0x825   :  { %4164 = vpow2.f32 %v1011_v3  ;;  %v1010_v6 = vsub.f32 %v1000_v62, %v1008_v5  ;;  %3905 = vmatpush3.msra.mxu1 %v1026_v4  ;;  %v4127_v62 = vld [vmem:[%s4913_s6 + $0x8] sm:$0xff]  }
 0x826   :  { %3914 = vmatprep.subr.mxu1 %v4238_v14 }
 0x827   :  { %v1013_v7 = vmul.f32 1.442695, %v1010_v6 }
 0x828   :  { %v1102_v8 = vpop.permute.xlu1 %1101 }
 0x829   :  { %4166 = vpow2.f32 %v1013_v7  ;;  %3910 = vmatpush3.msra.mxu0 %v1102_v8 }
 0x82a   :  { %3919 = vmatprep.subr.mxu0 %v4238_v14 }
 0x82c   :  { %v1180_v18 = vpop.permute.xlu1 %1179 }
 0x82f   :  { %v4165_v9 = vpop.eup %4164 }
 0x830   :  { %v1015_v10 = vsel %vm191_vm2, %v4165_v9, 0.0  ;;  %v1258_v22 = vpop.permute.xlu1 %1257 }
 0x831   :  { %1016 = vadd.xlane.f32.xlu0 %v1015_v10 }
 0x833   :  { %v4167_v12 = vpop.eup %4166 }
 0x834   :  { %v1018_v15 = vsel %vm191_vm2, %v4167_v12, 0.0  ;;  %v1256_v25 = vpop.permute.xlu1 %1255 }
 0x835   :  { %1019 = vadd.xlane.f32.xlu0 %v1018_v15 }
 0x84b   :  { %1177 = vrot.lane.b32.xlu0 %v4381_v36, %s4930_s17 }
 0x8be   :  { %v1017_v16 = vpop.xlane.xlu0 %1016 }
 0x8bf   :  { %4168 = vrcp.f32 %v1017_v16 }
 0x8c2   :  { %v1020_v17 = vpop.xlane.xlu0 %1019 }
 0x8c3   :  { %4170 = vrcp.f32 %v1020_v17 }
 0x8c6   :  { %v1178_v24 = vpop.permute.xlu0 %1177 }
 0x8c9   :  { %v4169_v19 = vpop.eup %4168 }
 0x8ca   :  { %v1023_v20 = vmul.f32 %v4169_v19, %v4165_v9 }
 0x8cc   :  { %3907 = vmatmul.mubr.msk.f32.vlgmr.msra.gmra.mrb[10].mxu1 %vm191_vm2, %v1023_v20 }
 0x8cd   :  { %v4171_v21 = vpop.eup %4170  ;;  %3915 = vmatpush3.xpose.msk.msra.mxu1 %vm191_vm2, %v1180_v18  ;;  %3916 = vmatprep.mubr.msk.f32.mxu1 %vm4239_vm1, %v4238_v14 }
 0x8ce   :  { %v1024_v23 = vmul.f32 %v4171_v21, %v4167_v12  ;;  %3924 = vmatprep.subr.mxu1 %v4238_v14 }
 0x8d0   :  { %3912 = vmatmul.mubr.msk.f32.vlgmr.msra.gmra.mrb[14].mxu0 %vm191_vm2, %v1024_v23  ;;  %3917 = vmatmul.mubr.msk.f32.vlgmr.msra.gmra.mrb[12].mxu1 %vm191_vm2, %v1178_v24 }
 0x8d1   :  { %3920 = vmatpush3.xpose.msk.msra.mxu0 %vm191_vm2, %v1258_v22  ;;  %3921 = vmatprep.mubr.msk.f32.mxu0 %vm4239_vm1, %v4238_v14 }
 0x8d2   :  { %3929 = vmatprep.subr.mxu0 %v4238_v14  ;;  %3926 = vmatprep.mubr.msk.f32.mxu1 %vm4239_vm1, %v4238_v14 }
 0x8d4   :  { %3922 = vmatmul.mubr.msk.f32.vlgmr.msra.gmra.mrb[16].mxu0 %vm191_vm2, %v1256_v25 }
 0x8d5   :  { %3931 = vmatprep.mubr.msk.f32.mxu0 %vm4239_vm1, %v4238_v14 }
 0x99f   :  { %v1097_v26 = vpop.f32.mrb[10].mxu1 }
 0x9a0   :  { %v3908_v27 = vpop.f32.mrb[11].mxu1 }
 0x9a3   :  { %v1173_v28 = vpop.f32.mrb[14].mxu0  ;;  %v1251_v29 = vpop.f32.mrb[12].mxu1 }
 0x9a4   :  { %v4099_v30 = vpack.i.bf16 %v1173_v28, %v1097_v26  ;;  %v1252_v33 = vadd.f32 %v4404_v43, %v1251_v29  ;;  %v3913_v34 = vpop.f32.mrb[15].mxu0  ;;  %v3918_v35 = vpop.f32.mrb[13].mxu1 }
 0x9a6   :  { %v1333_v37 = vsel %vm191_vm2, %v1252_v33, -inf }
 0x9a7   :  { %1334 = vmax.xlane.f32.xlu0 %v1333_v37  ;;  %v1329_v38 = vpop.f32.mrb[16].mxu0 }
 0x9a8   :  { %v1330_v40 = vadd.f32 %v4409_v45, %v1329_v38  ;;  %v3923_v41 = vpop.f32.mrb[17].mxu0 }
 0x9aa   :  { %v1336_v42 = vsel %vm191_vm2, %v1330_v40, -inf }
 0x9ab   :  { %1337 = vmax.xlane.f32.xlu1 %v1336_v42 }
 0x9bc   :  { %1431 = vrot.lane.b32.xlu1 %v4383_v39, %s4928_s18 }
 0x9c0   :  { %4095 = vrot.lane.b32.xlu1 %v4094_v56, %s4927_s2 }
 0x9c4   :  { %4100 = vrot.lane.b32.xlu1 %v4099_v30, %s4925_s19  ;;  %s4926_s19 = smov 24  }
 0xa34   :  { %v1335_v44 = vpop.xlane.xlu0 %1334 }
 0xa35   :  { %v1339_v46 = vsub.f32 %v1252_v33, %v1335_v44 }
 0xa37   :  { %v1341_v47 = vmul.f32 1.442695, %v1339_v46 }
 0xa38   :  { %v1338_v48 = vpop.xlane.xlu1 %1337 }
 0xa39   :  { %4172 = vpow2.f32 %v1341_v47  ;;  %v1340_v49 = vsub.f32 %v1330_v40, %v1338_v48  ;;  %v4129_v47 = vld [vmem:[%s4915_s10 + $0x8] sm:$0xff]  }
 0xa3b   :  { %v1343_v50 = vmul.f32 1.442695, %v1340_v49 }
 0xa3c   :  { %v1432_v51 = vpop.permute.xlu1 %1431 }
 0xa3d   :  { %4174 = vpow2.f32 %v1343_v50  ;;  %3930 = vmatpush3.msra.mxu0 %v1432_v51 }
 0xa3e   :  { %3942 = vmatprep.subr.bf16.mxu0 %v4238_v14 }
 0xa40   :  { %v4096_v4 = vpop.permute.xlu1 %4095 }
 0xa41   :  { %v4098_v6 = vunpack.i.h.bf16 %v4096_v4  ;;  %v4097_v7 = vunpack.i.l.bf16 %v4096_v4 }
 0xa43   :  { %v4173_v39 = vpop.eup %4172  ;;  %v1532_v12 = vsel %vm191_vm2, %v4449_v13, %v4098_v6  ;;  %v1531_v15 = vsel %vm191_vm2, %v4447_v11, %v4097_v7  ;;  %v3662_v11 = vld [vmem:[%s4914_s7] ss:$0 sm:$0xff] }
 0xa44   :  { %v1345_v53 = vsel %vm191_vm2, %v4173_v39, 0.0  ;;  %v4101_v5 = vpop.permute.xlu1 %4100 }
 0xa45   :  { %1346 = vadd.xlane.f32.xlu0 %v1345_v53  ;;  %v4103_v8 = vunpack.i.h.bf16 %v4101_v5  ;;  %v4102_v9 = vunpack.i.l.bf16 %v4101_v5 }
 0xa47   :  { %v4175_v52 = vpop.eup %4174  ;;  %v1534_v18 = vsel %vm1533_vm3, %v1531_v15, %v4102_v9  ;;  %v1535_v19 = vsel %vm1533_vm3, %v1532_v12, %v4103_v8 }
 0xa48   :  { %v1348_v54 = vsel %vm191_vm2, %v4175_v52, 0.0 }
 0xa49   :  { %1349 = vadd.xlane.f32.xlu0 %v1348_v54 }
 0xa5f   :  { %1355 = vrot.lane.b32.xlu0 %v4381_v36, %s4928_s18  ;;  %v4126_v36 = vld [vmem:[%s4913_s6] sm:$0xff]  }
 0xad2   :  { %v1347_v55 = vpop.xlane.xlu0 %1346 }
 0xad3   :  { %4176 = vrcp.f32 %v1347_v55  ;;  %v3666_v55 = vld [vmem:[%s4916_s8] ss:$0 sm:$0xff] }
 0xad6   :  { %v1350_v56 = vpop.xlane.xlu0 %1349 }
 0xad7   :  { %4178 = vrcp.f32 %v1350_v56 }
 0xada   :  { %v1356_v57 = vpop.permute.xlu0 %1355 }
 0xadb   :  { %3925 = vmatpush3.msra.mxu1 %v1356_v57 }
 0xadc   :  { %3934 = vmatprep.subr.bf16.mxu1 %v4238_v14 }
 0xadd   :  { %v4177_v58 = vpop.eup %4176 }
 0xade   :  { %v1353_v59 = vmul.f32 %v4177_v58, %v4173_v39 }
 0xae0   :  { %3927 = vmatmul.mubr.msk.f32.vlgmr.msra.gmra.mrb[14].mxu1 %vm191_vm2, %v1353_v59  ;;  %v3667_v59 = vld [vmem:[%s4917_s9] ss:$0 sm:$0xff] }
 0xae1   :  { %v4179_v60 = vpop.eup %4178  ;;  %3938 = vmatprep.mubr.msk.bf16.mxu1 %vm4239_vm1, %v4238_v14  ;;  %3935 = vmatpush3.bf16.msra.mxu1 %v4126_v36 }
 0xae2   :  { %v1354_v61 = vmul.f32 %v4179_v60, %v4175_v52  ;;  %3936 = vmatprep.subr.bf16.mxu1 %v4238_v14 }
 0xae4   :  { %3932 = vmatmul.mubr.msk.f32.vlgmr.msra.gmra.mrb[18].mxu0 %vm191_vm2, %v1354_v61 }
 0xae5   :  { %3946 = vmatprep.mubr.msk.bf16.mxu0 %vm4239_vm1, %v4238_v14  ;;  %3937 = vmatpush3.bf16.msra.mxu1 %v4127_v62 }
 0xae6   :  { %3950 = vmatprep.subr.bf16.mxu1 %v4238_v14 }
 0xbb3   :  { %v1427_v63 = vpop.f32.mrb[14].mxu1 }
 0xbb4   :  { %v3928_v0 = vpop.f32.mrb[15].mxu1 }
 0xbb5   :  { %v4131_v0 = vld [vmem:[%s4918_s12 + $0x8] sm:$0xff]  }
 0xbb7   :  { %v1503_v1 = vpop.f32.mrb[18].mxu0 }
 0xbb8   :  { %v4104_v2 = vpack.i.bf16 %v1503_v1, %v1427_v63  ;;  %v3933_v3 = vpop.f32.mrb[19].mxu0  ;;  %v4130_v63 = vld [vmem:[%s4918_s12] sm:$0xff]   ;;  %v4132_v1 = vld [vmem:[%s4918_s12 + $0x10] sm:$0xff]  }
 0xbb9   :  { %v3668_v3 = vld [vmem:[%s4919_s11] ss:$0 sm:$0xff] }
 0xbba   :  { %4105 = vrot.lane.b32.xlu0 %v4104_v2, %s4926_s19  ;;  %v4133_v2 = vld [vmem:[%s4918_s12 + $0x18] sm:$0xff]  }
 0xc2c   :  { %v4106_v10 = vpop.permute.xlu0 %4105 }
 0xc2d   :  { %v4108_v16 = vunpack.i.h.bf16 %v4106_v10  ;;  %v4107_v17 = vunpack.i.l.bf16 %v4106_v10 }
 0xc2f   :  { %v1538_v20 = vsel %vm1536_vm4, %v1535_v19, %v4108_v16  ;;  %v1537_v21 = vsel %vm1536_vm4, %v1534_v18, %v4107_v17 }
 0xc30   :  { %v1539_v22 = vpack.c.bf16 %v1538_v20, %v1537_v21 }
 0xc32   :  { %3939 = vmatmul.mubr.msk.bf16.vlgmr.msra.gmra.mrb[16].mxu1 %vm58_vm0, %v1539_v22 }
 0xc33   :  { %3958 = vmatprep.mubr.msk.bf16.mxu1 %vm4239_vm1, %v4238_v14  ;;  %3951 = vmatpush3.bf16.msra.mxu1 %v4130_v63 }
 0xc34   :  { %3952 = vmatprep.subr.bf16.mxu1 %v4238_v14 }
 0xc37   :  { %3953 = vmatpush3.bf16.msra.mxu1 %v4131_v0 }
 0xc38   :  { %3954 = vmatprep.subr.bf16.mxu1 %v4238_v14 }
 0xc3b   :  { %3955 = vmatpush3.bf16.msra.mxu1 %v4132_v1 }
 0xc3c   :  { %3956 = vmatprep.subr.bf16.mxu1 %v4238_v14 }
 0xc3f   :  { %3957 = vmatpush3.bf16.msra.mxu1 %v4133_v2 }
 0xc40   :  { %3980 = vmatprep.subr.mxu1 %v4238_v14 }
 0xd05   :  { %v1596_v13 = vpop.f32.mrb[16].mxu1 }
 0xd06   :  { %v1597_v23 = vadd.f32 %v3662_v11, %v1596_v13  ;;  %v3940_v24 = vpop.f32.mrb[17].mxu1 }
 0xd07   :  { %v1599_v25 = vpop.f32.mrb[18].mxu1 }
 0xd08   :  { %v1600_v26 = vadd.f32 %v3662_v11, %v1599_v25  ;;  %v3941_v27 = vpop.f32.mrb[19].mxu1  ;;  %v1603_v28 = vadd.f32 %v1597_v23, %v4369_v31 }
 0xd0a   :  { %v1607_v29 = vsel %vm58_vm0, %v1603_v28, 0.0  ;;  %v1604_v30 = vadd.f32 %v1600_v26, %v4371_v32  ;;  %v4128_v32 = vld [vmem:[%s4915_s10] sm:$0xff]  }
 0xd0b   :  { %1608 = vadd.xlane.f32.xlu1 %v1607_v29  ;;  %3943 = vmatpush3.bf16.msra.mxu0 %v4128_v32 }
 0xd0c   :  { %v1610_v33 = vsel %vm58_vm0, %v1604_v30, 0.0  ;;  %3944 = vmatprep.subr.bf16.mxu0 %v4238_v14 }
 0xd0d   :  { %1611 = vadd.xlane.f32.xlu0 %v1610_v33 }
 0xd0f   :  { %3945 = vmatpush3.bf16.msra.mxu0 %v4129_v47 }
 0xd10   :  { %3962 = vmatprep.subr.bf16.mxu0 %v4238_v14 }
 0xd98   :  { %v1609_v34 = vpop.xlane.xlu1 %1608 }
 0xd99   :  { %v1613_v35 = vmul.f32 0.03125, %v1609_v34 }
 0xd9a   :  { %v1612_v37 = vpop.xlane.xlu0 %1611 }
 0xd9b   :  { %v1615_v38 = vsub.f32 %v1603_v28, %v1613_v35  ;;  %v1614_v40 = vmul.f32 0.03125, %v1612_v37 }
 0xd9d   :  { %v1616_v41 = vsub.f32 %v1604_v30, %v1614_v40  ;;  %v1617_v42 = vmul.f32 %v1615_v38, %v1615_v38  ;;  %v3672_v30 = vld [vmem:[%s4920_s13] ss:$0 sm:$0xff] }
 0xd9f   :  { %v1619_v44 = vsel %vm58_vm0, %v1617_v42, 0.0  ;;  %v1618_v46 = vmul.f32 %v1616_v41, %v1616_v41 }
 0xda0   :  { %1620 = vadd.xlane.f32.xlu0 %v1619_v44 }
 0xda1   :  { %v1622_v31 = vsel %vm58_vm0, %v1618_v46, 0.0 }
 0xda4   :  { %1623 = vadd.xlane.f32.xlu0 %v1622_v31 }
 0xe2d   :  { %v1621_v48 = vpop.xlane.xlu0 %1620 }
 0xe2e   :  { %v1625_v49 = vmul.f32 0.03125, %v1621_v48 }
 0xe30   :  { %v1627_v50 = vadd.f32 1e-12, %v1625_v49 }
 0xe31   :  { %v1624_v51 = vpop.xlane.xlu0 %1623 }
 0xe32   :  { %4180 = vrsqrt.f32 %v1627_v50  ;;  %v1626_v39 = vmul.f32 0.03125, %v1624_v51 }
 0xe34   :  { %v1628_v53 = vadd.f32 1e-12, %v1626_v39 }
 0xe36   :  { %4182 = vrsqrt.f32 %v1628_v53 }
 0xe3c   :  { %v4181_v52 = vpop.eup %4180 }
 0xe3d   :  { %v1631_v54 = vmul.f32 %v4181_v52, %v1615_v38 }
 0xe3f   :  { %v1639_v57 = vmul.f32 %v3666_v55, %v1631_v54  ;;  %v4134_v54 = vld [vmem:[%s4908_s4 + $0x10] sm:$0xff]  }
 0xe40   :  { %v4183_v56 = vpop.eup %4182 }
 0xe41   :  { %v1632_v58 = vmul.f32 %v4183_v56, %v1616_v41  ;;  %v1647_v61 = vadd.f32 %v3667_v59, %v1639_v57 }
 0xe43   :  { %v1640_v60 = vmul.f32 %v3666_v55, %v1632_v58  ;;  %v4135_v55 = vld [vmem:[%s4908_s4 + $0x18] sm:$0xff]  }
 0xe45   :  { %v1648_v36 = vadd.f32 %v3667_v59, %v1640_v60 }
 0xe47   :  { %v1649_v62 = vpack.c.bf16 %v1648_v36, %v1647_v61 }
 0xe49   :  { %3947 = vmatmul.mubr.msk.bf16.vlgmr.msra.gmra.mrb[20].mxu0 %vm58_vm0, %v1649_v62  ;;  %v3678_v62 = vld [vmem:[%s4921_s14] ss:$0 sm:$0xff] }
 0xe4a   :  { %3966 = vmatprep.mubr.msk.bf16.mxu0 %vm4239_vm1, %v4238_v14  ;;  %3963 = vmatpush3.bf16.msra.mxu0 %v4134_v54 }
 0xe4b   :  { %3964 = vmatprep.subr.bf16.mxu0 %v4238_v14 }
 0xe4e   :  { %3965 = vmatpush3.bf16.msra.mxu0 %v4135_v55 }
 0xe4f   :  { %3970 = vmatprep.subr.mxu0 %v4238_v14 }
 0xf1c   :  { %v1710_v4 = vpop.f32.mrb[20].mxu0 }
 0xf1d   :  { %v1711_v5 = vadd.f32 %v3668_v3, %v1710_v4  ;;  %v3948_v6 = vpop.f32.mrb[21].mxu0 }
 0xf1e   :  { %v1713_v7 = vpop.f32.mrb[22].mxu0 }
 0xf1f   :  { %v1719_v8 = vmul.f32 0.044715, %v1711_v5  ;;  %v1714_v9 = vadd.f32 %v3668_v3, %v1713_v7  ;;  %v3949_v10 = vpop.f32.mrb[23].mxu0  ;;  %v1717_v24 = vmul.f32 0.5, %v1711_v5  ;;  %v3679_v3 = vld [vmem:[%s4922_s15] ss:$0 sm:$0xff] }
 0xf21   :  { %v1721_v12 = vmul.f32 %v1719_v8, %v1711_v5  ;;  %v1720_v15 = vmul.f32 0.044715, %v1714_v9  ;;  %v1718_v25 = vmul.f32 0.5, %v1714_v9  ;;  %v3689_v8 = vld [vmem:[%s4911_s5 + $0x1] ss:$0 sm:$0xff] }
 0xf23   :  { %v1723_v16 = vmul.f32 %v1721_v12, %v1711_v5  ;;  %v1722_v17 = vmul.f32 %v1720_v15, %v1714_v9 }
 0xf25   :  { %v1725_v18 = vadd.f32 %v1723_v16, %v1711_v5  ;;  %v1724_v19 = vmul.f32 %v1722_v17, %v1714_v9 }
 0xf27   :  { %v1727_v20 = vmul.f32 0.7978846, %v1725_v18  ;;  %v1726_v21 = vadd.f32 %v1724_v19, %v1714_v9 }
 0xf29   :  { %4184 = vtanh.f32 %v1727_v20  ;;  %v1728_v22 = vmul.f32 0.7978846, %v1726_v21 }
 0xf2b   :  { %4186 = vtanh.f32 %v1728_v22 }
 0xf33   :  { %v4185_v11 = vpop.eup %4184 }
 0xf34   :  { %v1731_v13 = vadd.f32 1.0, %v4185_v11 }
 0xf35   :  { %v4187_v23 = vpop.eup %4186 }
 0xf36   :  { %v1732_v26 = vadd.f32 1.0, %v4187_v23  ;;  %v1733_v27 = vmul.f32 %v1731_v13, %v1717_v24 }
 0xf38   :  { %v1734_v28 = vmul.f32 %v1732_v26, %v1718_v25 }
 0xf3a   :  { %v1735_v29 = vpack.c.bf16 %v1734_v28, %v1733_v27 }
 0xf3c   :  { %3959 = vmatmul.mubr.msk.bf16.vlgmr.msra.gmra.mrb[20].mxu1 %vm1775_vm5, %v1735_v29 }
 0xf3d   :  { %3982 = vmatprep.mubr.msk.f32.mxu1 %vm4239_vm1, %v4238_v14 }
0x100f   :  { %v1813_v33 = vpop.f32.mrb[20].mxu1 }
0x1010   :  { %v1814_v34 = vadd.f32 %v3672_v30, %v1813_v33  ;;  %v3960_v35 = vpop.f32.mrb[21].mxu1 }
0x1011   :  { %v1816_v37 = vpop.f32.mrb[22].mxu1 }
0x1012   :  { %v1817_v38 = vadd.f32 %v3672_v30, %v1816_v37  ;;  %v3961_v40 = vpop.f32.mrb[23].mxu1  ;;  %v1820_v41 = vadd.f32 %v1814_v34, %v1647_v61 }
0x1014   :  { %v1824_v42 = vsel %vm58_vm0, %v1820_v41, 0.0  ;;  %v1821_v44 = vadd.f32 %v1817_v38, %v1648_v36 }
0x1015   :  { %1825 = vadd.xlane.f32.xlu1 %v1824_v42 }
0x1016   :  { %v1827_v46 = vsel %vm58_vm0, %v1821_v44, 0.0 }
0x1017   :  { %1828 = vadd.xlane.f32.xlu0 %v1827_v46 }
0x10a2   :  { %v1826_v31 = vpop.xlane.xlu1 %1825 }
0x10a3   :  { %v1830_v32 = vmul.f32 0.03125, %v1826_v31 }
0x10a4   :  { %v1829_v47 = vpop.xlane.xlu0 %1828 }
0x10a5   :  { %v1832_v48 = vsub.f32 %v1820_v41, %v1830_v32  ;;  %v1831_v49 = vmul.f32 0.03125, %v1829_v47 }
0x10a7   :  { %v1833_v50 = vsub.f32 %v1821_v44, %v1831_v49  ;;  %v1834_v51 = vmul.f32 %v1832_v48, %v1832_v48 }
0x10a9   :  { %v1836_v39 = vsel %vm58_vm0, %v1834_v51, 0.0  ;;  %v1835_v53 = vmul.f32 %v1833_v50, %v1833_v50 }
0x10aa   :  { %1837 = vadd.xlane.f32.xlu1 %v1836_v39 }
0x10ab   :  { %v1839_v52 = vsel %vm58_vm0, %v1835_v53, 0.0 }
0x10ac   :  { %1840 = vadd.xlane.f32.xlu0 %v1839_v52  ;;  %v4716_v52 = vld [vmem:[%s4912_s1] ss:$0 sm:$0xff] }
0x1137   :  { %v1838_v56 = vpop.xlane.xlu1 %1837 }
0x1138   :  { %v1842_v57 = vmul.f32 0.03125, %v1838_v56 }
0x1139   :  { %v1841_v58 = vpop.xlane.xlu0 %1840 }
0x113a   :  { %v1844_v59 = vadd.f32 1e-12, %v1842_v57  ;;  %v1843_v60 = vmul.f32 0.03125, %v1841_v58 }
0x113c   :  { %4188 = vrsqrt.f32 %v1844_v59  ;;  %v1845_v61 = vadd.f32 1e-12, %v1843_v60  ;;  %v4723_v59 = vld [vmem:[%s4912_s1 + $0x1] ss:$0 sm:$0xff]  ;;  %s4934_s1 = smov 104  }
0x113e   :  { %4190 = vrsqrt.f32 %v1845_v61 }
0x1146   :  { %v4189_v36 = vpop.eup %4188 }
0x1147   :  { %v1848_v63 = vmul.f32 %v4189_v36, %v1832_v48 }
0x1148   :  { %v4191_v0 = vpop.eup %4190 }
0x1149   :  { %v1856_v1 = vmul.f32 %v3678_v62, %v1848_v63  ;;  %v1849_v2 = vmul.f32 %v4191_v0, %v1833_v50 }
0x114b   :  { %v1857_v4 = vmul.f32 %v3678_v62, %v1849_v2  ;;  %v4641_v5 = vadd.f32 %v3679_v3, %v1856_v1 }
0x114d   :  { %v4643_v6 = vadd.f32 %v3679_v3, %v1857_v4 }
0x114f   :  { %v1876_v7 = vpack.c.bf16 %v4643_v6, %v4641_v5 }
0x1151   :  { %3967 = vmatmul.mubr.msk.bf16.vlgmr.msra.gmra.mrb[24].mxu0 %vm58_vm0, %v1876_v7 }
0x1152   :  { %3972 = vmatprep.mubr.msk.f32.mxu0 %vm4239_vm1, %v4238_v14 }
0x1224   :  { %v1934_v9 = vpop.f32.mrb[24].mxu0 }
0x1225   :  { %v4653_v10 = vadd.f32 %v3689_v8, %v1934_v9  ;;  %v3968_v12 = vpop.f32.mrb[25].mxu0 }
0x1226   :  { %v1937_v15 = vpop.f32.mrb[26].mxu0 }
0x1227   :  { %v4655_v16 = vadd.f32 %v3689_v8, %v1937_v15  ;;  %1942 = vrot.lane.b32.xlu1 %v4653_v10, %s4240_s3  ;;  %v3969_v17 = vpop.f32.mrb[27].mxu0 }
0x1229   :  { %2019 = vrot.lane.b32.xlu0 %v4655_v16, %s4240_s3 }
0x1299   :  { %v1943_v18 = vpop.permute.xlu1 %1942 }
0x129a   :  { %3971 = vmatpush3.xpose.msk.msra.mxu0 %vm191_vm2, %v1943_v18 }
0x129b   :  { %3975 = vmatprep.subr.mxu0 %v4238_v14  ;;  %v2020_v19 = vpop.permute.xlu0 %2019 }
0x129d   :  { %3973 = vmatmul.mubr.msk.f32.vlgmr.msra.gmra.mrb[28].mxu0 %vm191_vm2, %v4653_v10 }
0x129e   :  { %3976 = vmatpush3.xpose.msk.msra.mxu0 %vm191_vm2, %v2020_v19  ;;  %3977 = vmatprep.mubr.msk.f32.mxu0 %vm4239_vm1, %v4238_v14 }
0x129f   :  { %3985 = vmatprep.subr.mxu0 %v4238_v14 }
0x12a1   :  { %3978 = vmatmul.mubr.msk.f32.vlgmr.msra.gmra.mrb[30].mxu0 %vm191_vm2, %v4655_v16 }
0x12a2   :  { %3987 = vmatprep.mubr.msk.f32.mxu0 %vm4239_vm1, %v4238_v14 }
0x1370   :  { %v2014_v20 = vpop.f32.mrb[28].mxu0 }
0x1371   :  { %v2015_v21 = vadd.f32 %v4404_v43, %v2014_v20  ;;  %v3974_v22 = vpop.f32.mrb[29].mxu0 }
0x1373   :  { %v2095_v11 = vsel %vm191_vm2, %v2015_v21, -inf }
0x1374   :  { %2096 = vmax.xlane.f32.xlu1 %v2095_v11  ;;  %v2091_v13 = vpop.f32.mrb[30].mxu0 }
0x1375   :  { %v2092_v23 = vadd.f32 %v4409_v45, %v2091_v13  ;;  %v3979_v24 = vpop.f32.mrb[31].mxu0 }
0x1377   :  { %v2098_v25 = vsel %vm191_vm2, %v2092_v23, -inf }
0x1378   :  { %2099 = vmax.xlane.f32.xlu0 %v2098_v25 }
0x1385   :  { %2117 = vrot.lane.b32.xlu1 %v4653_v10, %s4241_s24 }
0x1389   :  { %2271 = vrot.lane.b32.xlu1 %v4653_v10, %s4242_s25 }
0x138d   :  { %2349 = vrot.lane.b32.xlu1 %v4655_v16, %s4242_s25 }
0x138e   :  { %2193 = vrot.lane.b32.xlu0 %v4655_v16, %s4241_s24 }
0x1401   :  { %v2097_v43 = vpop.xlane.xlu1 %2096 }
0x1402   :  { %v2101_v26 = vsub.f32 %v2015_v21, %v2097_v43 }
0x1404   :  { %v2103_v27 = vmul.f32 1.442695, %v2101_v26 }
0x1405   :  { %v2118_v45 = vpop.permute.xlu1 %2117  ;;  %v2100_v28 = vpop.xlane.xlu0 %2099 }
0x1406   :  { %4192 = vpow2.f32 %v2103_v27  ;;  %v2102_v29 = vsub.f32 %v2092_v23, %v2100_v28  ;;  %3981 = vmatpush3.msra.mxu1 %v2118_v45 }
0x1407   :  { %3990 = vmatprep.subr.mxu1 %v4238_v14 }
0x1408   :  { %v2105_v30 = vmul.f32 1.442695, %v2102_v29 }
0x1409   :  { %v2194_v33 = vpop.permute.xlu0 %2193  ;;  %v2272_v40 = vpop.permute.xlu1 %2271 }
0x140a   :  { %4194 = vpow2.f32 %v2105_v30  ;;  %3986 = vmatpush3.msra.mxu0 %v2194_v33 }
0x140b   :  { %3995 = vmatprep.subr.mxu0 %v4238_v14 }
0x140d   :  { %v2350_v41 = vpop.permute.xlu1 %2349 }
0x1410   :  { %v4193_v34 = vpop.eup %4192 }
0x1411   :  { %v2107_v35 = vsel %vm191_vm2, %v4193_v34, 0.0 }
0x1412   :  { %2108 = vadd.xlane.f32.xlu1 %v2107_v35 }
0x1414   :  { %v4195_v37 = vpop.eup %4194 }
0x1415   :  { %v2110_v38 = vsel %vm191_vm2, %v4195_v37, 0.0 }
0x1416   :  { %2111 = vadd.xlane.f32.xlu0 %v2110_v38 }
0x1423   :  { %2269 = vrot.lane.b32.xlu1 %v4653_v10, %s4243_s26 }
0x142c   :  { %2347 = vrot.lane.b32.xlu0 %v4655_v16, %s4243_s26  ;;  %s4935_s26 = smov 40  }
0x149f   :  { %v2109_v42 = vpop.xlane.xlu1 %2108 }
0x14a0   :  { %4196 = vrcp.f32 %v2109_v42 }
0x14a3   :  { %v2112_v44 = vpop.xlane.xlu0 %2111  ;;  %v2270_v48 = vpop.permute.xlu1 %2269 }
0x14a4   :  { %4198 = vrcp.f32 %v2112_v44 }
0x14a7   :  { %v2348_v49 = vpop.permute.xlu0 %2347 }
0x14aa   :  { %v4197_v46 = vpop.eup %4196 }
0x14ab   :  { %v2115_v31 = vmul.f32 %v4197_v46, %v4193_v34 }
0x14ad   :  { %3983 = vmatmul.mubr.msk.f32.vlgmr.msra.gmra.mrb[24].mxu1 %vm191_vm2, %v2115_v31 }
0x14ae   :  { %v4199_v32 = vpop.eup %4198  ;;  %3991 = vmatpush3.xpose.msk.msra.mxu1 %vm191_vm2, %v2272_v40  ;;  %3992 = vmatprep.mubr.msk.f32.mxu1 %vm4239_vm1, %v4238_v14 }
0x14af   :  { %v2116_v47 = vmul.f32 %v4199_v32, %v4195_v37  ;;  %4000 = vmatprep.subr.mxu1 %v4238_v14 }
0x14b1   :  { %3988 = vmatmul.mubr.msk.f32.vlgmr.msra.gmra.mrb[32].mxu0 %vm191_vm2, %v2116_v47  ;;  %3993 = vmatmul.mubr.msk.f32.vlgmr.msra.gmra.mrb[26].mxu1 %vm191_vm2, %v2270_v48 }
0x14b2   :  { %3996 = vmatpush3.xpose.msk.msra.mxu0 %vm191_vm2, %v2350_v41  ;;  %3997 = vmatprep.mubr.msk.f32.mxu0 %vm4239_vm1, %v4238_v14 }
0x14b3   :  { %4005 = vmatprep.subr.mxu0 %v4238_v14  ;;  %4002 = vmatprep.mubr.msk.f32.mxu1 %vm4239_vm1, %v4238_v14 }
0x14b5   :  { %3998 = vmatmul.mubr.msk.f32.vlgmr.msra.gmra.mrb[34].mxu0 %vm191_vm2, %v2348_v49 }
0x14b6   :  { %4007 = vmatprep.mubr.msk.f32.mxu0 %vm4239_vm1, %v4238_v14 }
0x1580   :  { %v4709_v50 = vpop.f32.mrb[24].mxu1 }
0x1581   :  { %v3984_v51 = vpop.f32.mrb[25].mxu1 }
0x1584   :  { %v4711_v39 = vpop.f32.mrb[32].mxu0  ;;  %v2343_v53 = vpop.f32.mrb[26].mxu1 }
0x1585   :  { %v2344_v54 = vadd.f32 %v4716_v52, %v2343_v53  ;;  %v3989_v55 = vpop.f32.mrb[33].mxu0  ;;  %v3994_v56 = vpop.f32.mrb[27].mxu1 }
0x1587   :  { %v2425_v57 = vsel %vm191_vm2, %v2344_v54, -inf }
0x1588   :  { %2426 = vmax.xlane.f32.xlu1 %v2425_v57  ;;  %v2421_v58 = vpop.f32.mrb[34].mxu0 }
0x1589   :  { %v2422_v60 = vadd.f32 %v4723_v59, %v2421_v58  ;;  %v3999_v61 = vpop.f32.mrb[35].mxu0 }
0x158b   :  { %v2428_v36 = vsel %vm191_vm2, %v2422_v60, -inf }
0x158c   :  { %2429 = vmax.xlane.f32.xlu0 %v2428_v36 }
0x1599   :  { %2447 = vrot.lane.b32.xlu1 %v4653_v10, %s4244_s27 }
0x159d   :  { %2601 = vrot.lane.b32.xlu1 %v4653_v10, %s4245_s28 }
0x15a1   :  { %2679 = vrot.lane.b32.xlu1 %v4655_v16, %s4245_s28  ;;  %s4937_s28 = smov 16  }
0x15a2   :  { %2523 = vrot.lane.b32.xlu0 %v4655_v16, %s4244_s27  ;;  %s4936_s27 = smov 8  }
0x15a5   :  { %2599 = vrot.lane.b32.xlu1 %v4653_v10, %s4246_s29 }
0x1615   :  { %v2427_v62 = vpop.xlane.xlu1 %2426 }
0x1616   :  { %v2431_v63 = vsub.f32 %v2344_v54, %v2427_v62 }
0x1618   :  { %v2433_v0 = vmul.f32 1.442695, %v2431_v63 }
0x1619   :  { %v2448_v1 = vpop.permute.xlu1 %2447  ;;  %v2430_v2 = vpop.xlane.xlu0 %2429 }
0x161a   :  { %4200 = vpow2.f32 %v2433_v0  ;;  %v2432_v3 = vsub.f32 %v2422_v60, %v2430_v2  ;;  %4001 = vmatpush3.msra.mxu1 %v2448_v1 }
0x161b   :  { %4010 = vmatprep.subr.mxu1 %v4238_v14 }
0x161c   :  { %v2435_v4 = vmul.f32 1.442695, %v2432_v3 }
0x161d   :  { %v2524_v7 = vpop.permute.xlu0 %2523  ;;  %v2602_v19 = vpop.permute.xlu1 %2601 }
0x161e   :  { %4202 = vpow2.f32 %v2435_v4  ;;  %4006 = vmatpush3.msra.mxu0 %v2524_v7 }
0x161f   :  { %4015 = vmatprep.subr.mxu0 %v4238_v14 }
0x1621   :  { %v2680_v21 = vpop.permute.xlu1 %2679 }
0x1624   :  { %v4201_v8 = vpop.eup %4200 }
0x1625   :  { %v2437_v9 = vsel %vm191_vm2, %v4201_v8, 0.0  ;;  %v2600_v23 = vpop.permute.xlu1 %2599 }
0x1626   :  { %2438 = vadd.xlane.f32.xlu0 %v2437_v9 }
0x1628   :  { %v4203_v12 = vpop.eup %4202 }
0x1629   :  { %v2440_v15 = vsel %vm191_vm2, %v4203_v12, 0.0 }
0x162a   :  { %2441 = vadd.xlane.f32.xlu0 %v2440_v15 }
0x1640   :  { %2677 = vrot.lane.b32.xlu0 %v4655_v16, %s4246_s29 }
0x16b3   :  { %v2439_v17 = vpop.xlane.xlu0 %2438 }
0x16b4   :  { %4204 = vrcp.f32 %v2439_v17 }
0x16b7   :  { %v2442_v18 = vpop.xlane.xlu0 %2441 }
0x16b8   :  { %4206 = vrcp.f32 %v2442_v18 }
0x16bb   :  { %v2678_v24 = vpop.permute.xlu0 %2677 }
0x16be   :  { %v4205_v20 = vpop.eup %4204 }
0x16bf   :  { %v2445_v22 = vmul.f32 %v4205_v20, %v4201_v8 }
0x16c1   :  { %4003 = vmatmul.mubr.msk.f32.vlgmr.msra.gmra.mrb[28].mxu1 %vm191_vm2, %v2445_v22 }
0x16c2   :  { %v4207_v11 = vpop.eup %4206  ;;  %4011 = vmatpush3.xpose.msk.msra.mxu1 %vm191_vm2, %v2602_v19  ;;  %4012 = vmatprep.mubr.msk.f32.mxu1 %vm4239_vm1, %v4238_v14 }
0x16c3   :  { %v2446_v13 = vmul.f32 %v4207_v11, %v4203_v12  ;;  %4020 = vmatprep.subr.mxu1 %v4238_v14 }
0x16c5   :  { %4008 = vmatmul.mubr.msk.f32.vlgmr.msra.gmra.mrb[36].mxu0 %vm191_vm2, %v2446_v13  ;;  %4013 = vmatmul.mubr.msk.f32.vlgmr.msra.gmra.mrb[30].mxu1 %vm191_vm2, %v2600_v23 }
0x16c6   :  { %4016 = vmatpush3.xpose.msk.msra.mxu0 %vm191_vm2, %v2680_v21  ;;  %4017 = vmatprep.mubr.msk.f32.mxu0 %vm4239_vm1, %v4238_v14 }
0x16c7   :  { %4025 = vmatprep.subr.mxu0 %v4238_v14  ;;  %4022 = vmatprep.mubr.msk.f32.mxu1 %vm4239_vm1, %v4238_v14 }
0x16c9   :  { %4018 = vmatmul.mubr.msk.f32.vlgmr.msra.gmra.mrb[38].mxu0 %vm191_vm2, %v2678_v24 }
0x16ca   :  { %4027 = vmatprep.mubr.msk.f32.mxu0 %vm4239_vm1, %v4238_v14 }
0x1794   :  { %v4759_v25 = vpop.f32.mrb[28].mxu1 }
0x1795   :  { %v4004_v43 = vpop.f32.mrb[29].mxu1 }
0x1798   :  { %v4761_v26 = vpop.f32.mrb[36].mxu0  ;;  %v2673_v27 = vpop.f32.mrb[30].mxu1 }
0x1799   :  { %v4109_v45 = vpack.i.bf16 %v4761_v26, %v4759_v25  ;;  %v2674_v28 = vadd.f32 %v4716_v52, %v2673_v27  ;;  %v4009_v29 = vpop.f32.mrb[37].mxu0  ;;  %v4014_v30 = vpop.f32.mrb[31].mxu1 }
0x179b   :  { %v2755_v33 = vsel %vm191_vm2, %v2674_v28, -inf }
0x179c   :  { %2756 = vmax.xlane.f32.xlu1 %v2755_v33  ;;  %v2751_v34 = vpop.f32.mrb[38].mxu0  ;;  %v4137_v33 = vld [vmem:[%s4913_s6 + $0x18] sm:$0xff]  }
0x179d   :  { %v2752_v35 = vadd.f32 %v4723_v59, %v2751_v34  ;;  %v4019_v37 = vpop.f32.mrb[39].mxu0 }
0x179f   :  { %v2758_v38 = vsel %vm191_vm2, %v2752_v35, -inf }
0x17a0   :  { %2759 = vmax.xlane.f32.xlu0 %v2758_v38 }
0x17ad   :  { %2777 = vrot.lane.b32.xlu1 %v4653_v10, %s4247_s30 }
0x17b1   :  { %2931 = vrot.lane.b32.xlu1 %v4653_v10, %s4248_s0 }
0x17b5   :  { %3009 = vrot.lane.b32.xlu1 %v4655_v16, %s4248_s0 }
0x17b6   :  { %2853 = vrot.lane.b32.xlu0 %v4655_v16, %s4247_s30 }
0x17b9   :  { %2929 = vrot.lane.b32.xlu1 %v4653_v10, %s4934_s1 }
0x1829   :  { %v2757_v40 = vpop.xlane.xlu1 %2756 }
0x182a   :  { %v2761_v41 = vsub.f32 %v2674_v28, %v2757_v40 }
0x182c   :  { %v2763_v42 = vmul.f32 1.442695, %v2761_v41 }
0x182d   :  { %v2778_v44 = vpop.permute.xlu1 %2777  ;;  %v2760_v46 = vpop.xlane.xlu0 %2759 }
0x182e   :  { %4208 = vpow2.f32 %v2763_v42  ;;  %v2762_v31 = vsub.f32 %v2752_v35, %v2760_v46  ;;  %4021 = vmatpush3.msra.mxu1 %v2778_v44 }
0x182f   :  { %4030 = vmatprep.subr.mxu1 %v4238_v14 }
0x1830   :  { %v2765_v32 = vmul.f32 1.442695, %v2762_v31 }
0x1831   :  { %v2854_v47 = vpop.permute.xlu0 %2853  ;;  %v2932_v56 = vpop.permute.xlu1 %2931 }
0x1832   :  { %4210 = vpow2.f32 %v2765_v32  ;;  %4026 = vmatpush3.msra.mxu0 %v2854_v47 }
0x1833   :  { %4035 = vmatprep.subr.mxu0 %v4238_v14 }
0x1835   :  { %v3010_v58 = vpop.permute.xlu1 %3009 }
0x1838   :  { %v4209_v48 = vpop.eup %4208 }
0x1839   :  { %v2767_v49 = vsel %vm191_vm2, %v4209_v48, 0.0  ;;  %v2930_v62 = vpop.permute.xlu1 %2929 }
0x183a   :  { %2768 = vadd.xlane.f32.xlu0 %v2767_v49 }
0x183c   :  { %v4211_v51 = vpop.eup %4210 }
0x183d   :  { %v2770_v53 = vsel %vm191_vm2, %v4211_v51, 0.0 }
0x183e   :  { %2771 = vadd.xlane.f32.xlu0 %v2770_v53 }
0x1854   :  { %3007 = vrot.lane.b32.xlu0 %v4655_v16, %s4934_s1 }
0x18c7   :  { %v2769_v54 = vpop.xlane.xlu0 %2768 }
0x18c8   :  { %4212 = vrcp.f32 %v2769_v54 }
0x18cb   :  { %v2772_v55 = vpop.xlane.xlu0 %2771 }
0x18cc   :  { %4214 = vrcp.f32 %v2772_v55 }
0x18cf   :  { %v3008_v63 = vpop.permute.xlu0 %3007 }
0x18d2   :  { %v4213_v57 = vpop.eup %4212 }
0x18d3   :  { %v2775_v60 = vmul.f32 %v4213_v57, %v4209_v48 }
0x18d5   :  { %4023 = vmatmul.mubr.msk.f32.vlgmr.msra.gmra.mrb[32].mxu1 %vm191_vm2, %v2775_v60 }
0x18d6   :  { %v4215_v61 = vpop.eup %4214  ;;  %4031 = vmatpush3.xpose.msk.msra.mxu1 %vm191_vm2, %v2932_v56  ;;  %4032 = vmatprep.mubr.msk.f32.mxu1 %vm4239_vm1, %v4238_v14 }
0x18d7   :  { %v2776_v36 = vmul.f32 %v4215_v61, %v4211_v51  ;;  %4040 = vmatprep.subr.mxu1 %v4238_v14 }
0x18d9   :  { %4028 = vmatmul.mubr.msk.f32.vlgmr.msra.gmra.mrb[40].mxu0 %vm191_vm2, %v2776_v36  ;;  %4033 = vmatmul.mubr.msk.f32.vlgmr.msra.gmra.mrb[34].mxu1 %vm191_vm2, %v2930_v62 }
0x18da   :  { %4036 = vmatpush3.xpose.msk.msra.mxu0 %vm191_vm2, %v3010_v58  ;;  %4037 = vmatprep.mubr.msk.f32.mxu0 %vm4239_vm1, %v4238_v14 }
0x18db   :  { %4045 = vmatprep.subr.mxu0 %v4238_v14  ;;  %4042 = vmatprep.mubr.msk.f32.mxu1 %vm4239_vm1, %v4238_v14 }
0x18dd   :  { %4038 = vmatmul.mubr.msk.f32.vlgmr.msra.gmra.mrb[42].mxu0 %vm191_vm2, %v3008_v63 }
0x18de   :  { %4047 = vmatprep.mubr.msk.f32.mxu0 %vm4239_vm1, %v4238_v14 }
0x19a8   :  { %v2849_v0 = vpop.f32.mrb[32].mxu1 }
0x19a9   :  { %v4024_v1 = vpop.f32.mrb[33].mxu1 }
0x19ac   :  { %v2925_v2 = vpop.f32.mrb[40].mxu0  ;;  %v3003_v3 = vpop.f32.mrb[34].mxu1 }
0x19ad   :  { %v4114_v4 = vpack.i.bf16 %v2925_v2, %v2849_v0  ;;  %v3004_v7 = vadd.f32 %v4716_v52, %v3003_v3  ;;  %v4029_v8 = vpop.f32.mrb[41].mxu0  ;;  %v4034_v9 = vpop.f32.mrb[35].mxu1 }
0x19af   :  { %v3085_v12 = vsel %vm191_vm2, %v3004_v7, -inf }
0x19b0   :  { %3086 = vmax.xlane.f32.xlu1 %v3085_v12  ;;  %v3081_v15 = vpop.f32.mrb[42].mxu0 }
0x19b1   :  { %v3082_v17 = vadd.f32 %v4723_v59, %v3081_v15  ;;  %v4039_v18 = vpop.f32.mrb[43].mxu0 }
0x19b3   :  { %v3088_v19 = vsel %vm191_vm2, %v3082_v17, -inf }
0x19b4   :  { %3089 = vmax.xlane.f32.xlu0 %v3088_v19 }
0x19c1   :  { %3107 = vrot.lane.b32.xlu1 %v4653_v10, %s4935_s26 }
0x19c5   :  { %4110 = vrot.lane.b32.xlu1 %v4109_v45, %s4936_s27 }
0x19c9   :  { %4115 = vrot.lane.b32.xlu1 %v4114_v4, %s4937_s28 }
0x1a3d   :  { %v3087_v52 = vpop.xlane.xlu1 %3086 }
0x1a3e   :  { %v3091_v20 = vsub.f32 %v3004_v7, %v3087_v52  ;;  %v4139_v52 = vld [vmem:[%s4915_s10 + $0x18] sm:$0xff]  }
0x1a40   :  { %v3093_v21 = vmul.f32 1.442695, %v3091_v20 }
0x1a41   :  { %v3108_v22 = vpop.permute.xlu1 %3107  ;;  %v3090_v11 = vpop.xlane.xlu0 %3089 }
0x1a42   :  { %4216 = vpow2.f32 %v3093_v21  ;;  %v3092_v59 = vsub.f32 %v3082_v17, %v3090_v11  ;;  %4041 = vmatpush3.msra.mxu1 %v3108_v22 }
0x1a43   :  { %4050 = vmatprep.subr.bf16.mxu1 %v4238_v14 }
0x1a44   :  { %v3095_v13 = vmul.f32 1.442695, %v3092_v59 }
0x1a45   :  { %v4111_v41 = vpop.permute.xlu1 %4110 }
0x1a46   :  { %4218 = vpow2.f32 %v3095_v13  ;;  %v4113_v44 = vunpack.i.h.bf16 %v4111_v41  ;;  %v4112_v46 = vunpack.i.l.bf16 %v4111_v41 }
0x1a48   :  { %v3284_v48 = vsel %vm191_vm2, %v4711_v39, %v4113_v44  ;;  %v3283_v49 = vsel %vm191_vm2, %v4709_v50, %v4112_v46  ;;  %v3718_v50 = vld [vmem:[%s4914_s7 + $0x1] ss:$0 sm:$0xff] }
0x1a49   :  { %v4116_v42 = vpop.permute.xlu1 %4115 }
0x1a4a   :  { %v4118_v31 = vunpack.i.h.bf16 %v4116_v42  ;;  %v4117_v32 = vunpack.i.l.bf16 %v4116_v42 }
0x1a4c   :  { %v4217_v10 = vpop.eup %4216  ;;  %v3286_v54 = vsel %vm1533_vm3, %v3284_v48, %v4118_v31  ;;  %v3285_v55 = vsel %vm1533_vm3, %v3283_v49, %v4117_v32 }
0x1a4d   :  { %v3097_v23 = vsel %vm191_vm2, %v4217_v10, 0.0 }
0x1a4e   :  { %3098 = vadd.xlane.f32.xlu0 %v3097_v23 }
0x1a50   :  { %v4219_v24 = vpop.eup %4218 }
0x1a51   :  { %v3100_v25 = vsel %vm191_vm2, %v4219_v24, 0.0 }
0x1a52   :  { %3101 = vadd.xlane.f32.xlu0 %v3100_v25 }
0x1a68   :  { %3183 = vrot.lane.b32.xlu0 %v4655_v16, %s4935_s26  ;;  %v4136_v16 = vld [vmem:[%s4913_s6 + $0x10] sm:$0xff]  }
0x1adb   :  { %v3099_v43 = vpop.xlane.xlu0 %3098 }
0x1adc   :  { %4220 = vrcp.f32 %v3099_v43 }
0x1adf   :  { %v3102_v26 = vpop.xlane.xlu0 %3101 }
0x1ae0   :  { %4222 = vrcp.f32 %v3102_v26 }
0x1ae3   :  { %v3184_v27 = vpop.permute.xlu0 %3183 }
0x1ae4   :  { %4046 = vmatpush3.msra.mxu0 %v3184_v27  ;;  %v3725_v27 = vld [vmem:[%s4917_s9 + $0x1] ss:$0 sm:$0xff] }
0x1ae5   :  { %4058 = vmatprep.subr.bf16.mxu0 %v4238_v14 }
0x1ae6   :  { %v4221_v45 = vpop.eup %4220 }
0x1ae7   :  { %v3105_v28 = vmul.f32 %v4221_v45, %v4217_v10 }
0x1ae9   :  { %4043 = vmatmul.mubr.msk.f32.vlgmr.msra.gmra.mrb[36].mxu1 %vm191_vm2, %v3105_v28 }
0x1aea   :  { %v4223_v29 = vpop.eup %4222  ;;  %4054 = vmatprep.mubr.msk.bf16.mxu1 %vm4239_vm1, %v4238_v14  ;;  %4051 = vmatpush3.bf16.msra.mxu1 %v4136_v16  ;;  %v4140_v16 = vld [vmem:[%s4918_s12 + $0x20] sm:$0xff]  }
0x1aeb   :  { %v3106_v30 = vmul.f32 %v4223_v29, %v4219_v24  ;;  %4052 = vmatprep.subr.bf16.mxu1 %v4238_v14  ;;  %v3724_v24 = vld [vmem:[%s4916_s8 + $0x1] ss:$0 sm:$0xff] }
0x1aed   :  { %4048 = vmatmul.mubr.msk.f32.vlgmr.msra.gmra.mrb[44].mxu0 %vm191_vm2, %v3106_v30 }
0x1aee   :  { %4062 = vmatprep.mubr.msk.bf16.mxu0 %vm4239_vm1, %v4238_v14  ;;  %4053 = vmatpush3.bf16.msra.mxu1 %v4137_v33  ;;  %v4141_v33 = vld [vmem:[%s4918_s12 + $0x28] sm:$0xff]  }
0x1aef   :  { %4066 = vmatprep.subr.bf16.mxu1 %v4238_v14 }
0x1bbc   :  { %v3179_v34 = vpop.f32.mrb[36].mxu1 }
0x1bbd   :  { %v4044_v35 = vpop.f32.mrb[37].mxu1 }
0x1bbe   :  { %v4143_v35 = vld [vmem:[%s4918_s12 + $0x38] sm:$0xff]  }
0x1bc0   :  { %v3255_v37 = vpop.f32.mrb[44].mxu0 }
0x1bc1   :  { %v4119_v38 = vpack.i.bf16 %v3255_v37, %v3179_v34  ;;  %v4049_v40 = vpop.f32.mrb[45].mxu0  ;;  %v4142_v34 = vld [vmem:[%s4918_s12 + $0x30] sm:$0xff]   ;;  %v3731_v37 = vld [vmem:[%s4919_s11 + $0x1] ss:$0 sm:$0xff] }
0x1bc3   :  { %4120 = vrot.lane.b32.xlu1 %v4119_v38, %s4938_s20 }
0x1c35   :  { %v4121_v47 = vpop.permute.xlu1 %4120 }
0x1c36   :  { %v4123_v51 = vunpack.i.h.bf16 %v4121_v47  ;;  %v4122_v53 = vunpack.i.l.bf16 %v4121_v47 }
0x1c38   :  { %v3288_v56 = vsel %vm1536_vm4, %v3286_v54, %v4123_v51  ;;  %v3287_v57 = vsel %vm1536_vm4, %v3285_v55, %v4122_v53 }
0x1c39   :  { %v3289_v58 = vpack.c.bf16 %v3288_v56, %v3287_v57 }
0x1c3b   :  { %4055 = vmatmul.mubr.msk.bf16.vlgmr.msra.gmra.mrb[40].mxu1 %vm58_vm0, %v3289_v58 }
0x1c3c   :  { %4074 = vmatprep.mubr.msk.bf16.mxu1 %vm4239_vm1, %v4238_v14  ;;  %4067 = vmatpush3.bf16.msra.mxu1 %v4140_v16 }
0x1c3d   :  { %4068 = vmatprep.subr.bf16.mxu1 %v4238_v14 }
0x1c40   :  { %4069 = vmatpush3.bf16.msra.mxu1 %v4141_v33 }
0x1c41   :  { %4070 = vmatprep.subr.bf16.mxu1 %v4238_v14 }
0x1c44   :  { %4071 = vmatpush3.bf16.msra.mxu1 %v4142_v34 }
0x1c45   :  { %4072 = vmatprep.subr.bf16.mxu1 %v4238_v14 }
0x1c48   :  { %4073 = vmatpush3.bf16.msra.mxu1 %v4143_v35 }
0x1d0e   :  { %v3347_v39 = vpop.f32.mrb[40].mxu1 }
0x1d0f   :  { %v3348_v60 = vadd.f32 %v3718_v50, %v3347_v39  ;;  %v4056_v61 = vpop.f32.mrb[41].mxu1 }
0x1d10   :  { %v3350_v36 = vpop.f32.mrb[42].mxu1 }
0x1d11   :  { %v3351_v62 = vadd.f32 %v3718_v50, %v3350_v36  ;;  %v4057_v63 = vpop.f32.mrb[43].mxu1  ;;  %v3354_v0 = vadd.f32 %v3348_v60, %v4641_v5 }
0x1d12   :  { %v3744_v63 = vld [vmem:[%s4920_s13 + $0x1] ss:$0 sm:$0xff] }
0x1d13   :  { %v3360_v1 = vsel %vm58_vm0, %v3354_v0, 0.0  ;;  %v3355_v2 = vadd.f32 %v3351_v62, %v4643_v6  ;;  %v4138_v6 = vld [vmem:[%s4915_s10 + $0x10] sm:$0xff]  }
0x1d14   :  { %3361 = vadd.xlane.f32.xlu0 %v3360_v1  ;;  %4059 = vmatpush3.bf16.msra.mxu0 %v4138_v6 }
0x1d15   :  { %v3363_v3 = vsel %vm58_vm0, %v3355_v2, 0.0  ;;  %4060 = vmatprep.subr.bf16.mxu0 %v4238_v14 }
0x1d16   :  { %3364 = vadd.xlane.f32.xlu1 %v3363_v3 }
0x1d18   :  { %4061 = vmatpush3.bf16.msra.mxu0 %v4139_v52 }
0x1da1   :  { %v3362_v4 = vpop.xlane.xlu0 %3361 }
0x1da2   :  { %v3366_v7 = vmul.f32 0.03125, %v3362_v4 }
0x1da3   :  { %v3365_v8 = vpop.xlane.xlu1 %3364 }
0x1da4   :  { %v3368_v9 = vsub.f32 %v3354_v0, %v3366_v7  ;;  %v3367_v12 = vmul.f32 0.03125, %v3365_v8 }
0x1da6   :  { %v3369_v15 = vsub.f32 %v3355_v2, %v3367_v12  ;;  %v3370_v17 = vmul.f32 %v3368_v9, %v3368_v9 }
0x1da8   :  { %v3372_v18 = vsel %vm58_vm0, %v3370_v17, 0.0  ;;  %v3371_v19 = vmul.f32 %v3369_v15, %v3369_v15 }
0x1da9   :  { %3373 = vadd.xlane.f32.xlu0 %v3372_v18 }
0x1daa   :  { %v3375_v5 = vsel %vm58_vm0, %v3371_v19, 0.0 }
0x1dad   :  { %3376 = vadd.xlane.f32.xlu0 %v3375_v5 }
0x1e36   :  { %v3374_v20 = vpop.xlane.xlu0 %3373 }
0x1e37   :  { %v3378_v21 = vmul.f32 0.03125, %v3374_v20 }
0x1e39   :  { %v3380_v22 = vadd.f32 1e-12, %v3378_v21 }
0x1e3a   :  { %v3377_v11 = vpop.xlane.xlu0 %3376 }
0x1e3b   :  { %4224 = vrsqrt.f32 %v3380_v22  ;;  %v3379_v59 = vmul.f32 0.03125, %v3377_v11 }
0x1e3d   :  { %v3381_v13 = vadd.f32 1e-12, %v3379_v59 }
0x1e3f   :  { %4226 = vrsqrt.f32 %v3381_v13 }
0x1e45   :  { %v4225_v10 = vpop.eup %4224 }
0x1e46   :  { %v3384_v23 = vmul.f32 %v4225_v10, %v3368_v9 }
0x1e48   :  { %v3392_v43 = vmul.f32 %v3724_v24, %v3384_v23 }
0x1e49   :  { %v4227_v25 = vpop.eup %4226 }
0x1e4a   :  { %v3385_v26 = vmul.f32 %v4227_v25, %v3369_v15  ;;  %v3400_v28 = vadd.f32 %v3725_v27, %v3392_v43 }
0x1e4c   :  { %v3393_v45 = vmul.f32 %v3724_v24, %v3385_v26  ;;  %v3752_v26 = vld [vmem:[%s4921_s14 + $0x1] ss:$0 sm:$0xff] }
0x1e4e   :  { %v3401_v29 = vadd.f32 %v3725_v27, %v3393_v45 }
0x1e50   :  { %v3402_v30 = vpack.c.bf16 %v3401_v29, %v3400_v28 }
0x1e52   :  { %4063 = vmatmul.mubr.msk.bf16.vlgmr.msra.gmra.mrb[48].mxu0 %vm58_vm0, %v3402_v30 }
0x1f25   :  { %v3465_v38 = vpop.f32.mrb[48].mxu0 }
0x1f26   :  { %v3466_v40 = vadd.f32 %v3731_v37, %v3465_v38  ;;  %v4064_v41 = vpop.f32.mrb[49].mxu0 }
0x1f27   :  { %v3468_v42 = vpop.f32.mrb[50].mxu0 }
0x1f28   :  { %v3474_v44 = vmul.f32 0.044715, %v3466_v40  ;;  %v3469_v46 = vadd.f32 %v3731_v37, %v3468_v42  ;;  %v4065_v31 = vpop.f32.mrb[51].mxu0  ;;  %v3472_v50 = vmul.f32 0.5, %v3466_v40 }
0x1f2a   :  { %v3476_v32 = vmul.f32 %v3474_v44, %v3466_v40  ;;  %v3475_v47 = vmul.f32 0.044715, %v3469_v46  ;;  %v3473_v39 = vmul.f32 0.5, %v3469_v46 }
0x1f2c   :  { %v3478_v48 = vmul.f32 %v3476_v32, %v3466_v40  ;;  %v3477_v49 = vmul.f32 %v3475_v47, %v3469_v46 }
0x1f2e   :  { %v3480_v51 = vadd.f32 %v3478_v48, %v3466_v40  ;;  %v3479_v53 = vmul.f32 %v3477_v49, %v3469_v46 }
0x1f30   :  { %v3482_v54 = vmul.f32 0.7978846, %v3480_v51  ;;  %v3481_v14 = vadd.f32 %v3479_v53, %v3469_v46 }
0x1f32   :  { %4228 = vtanh.f32 %v3482_v54  ;;  %v3483_v55 = vmul.f32 0.7978846, %v3481_v14 }
0x1f34   :  { %4230 = vtanh.f32 %v3483_v55 }
0x1f3c   :  { %v4229_v56 = vpop.eup %4228 }
0x1f3d   :  { %v3486_v57 = vadd.f32 1.0, %v4229_v56 }
0x1f3e   :  { %v4231_v58 = vpop.eup %4230 }
0x1f3f   :  { %v3487_v60 = vadd.f32 1.0, %v4231_v58  ;;  %v3488_v61 = vmul.f32 %v3486_v57, %v3472_v50 }
0x1f41   :  { %v3489_v36 = vmul.f32 %v3487_v60, %v3473_v39 }
0x1f43   :  { %v3490_v62 = vpack.c.bf16 %v3489_v36, %v3488_v61 }
0x1f45   :  { %4075 = vmatmul.mubr.msk.bf16.vlgmr.msra.gmra.mrb[44].mxu1 %vm1775_vm5, %v3490_v62 }
0x2018   :  { %v3569_v0 = vpop.f32.mrb[44].mxu1 }
0x2019   :  { %v3570_v1 = vadd.f32 %v3744_v63, %v3569_v0  ;;  %v4076_v2 = vpop.f32.mrb[45].mxu1 }
0x201a   :  { %v3572_v3 = vpop.f32.mrb[46].mxu1 }
0x201b   :  { %v3576_v4 = vadd.f32 %v3570_v1, %v3400_v28  ;;  %v3573_v7 = vadd.f32 %v3744_v63, %v3572_v3  ;;  %v4077_v8 = vpop.f32.mrb[47].mxu1  ;;  %v3753_v28 = vld [vmem:[%s4922_s15 + $0x1] ss:$0 sm:$0xff] }
0x201d   :  { %v3577_v9 = vadd.f32 %v3573_v7, %v3401_v29  ;;  %v3582_v12 = vsel %vm58_vm0, %v3576_v4, 0.0 }
0x201e   :  { %3583 = vadd.xlane.f32.xlu0 %v3582_v12 }
0x201f   :  { %v3585_v15 = vsel %vm58_vm0, %v3577_v9, 0.0 }
0x2020   :  { %3586 = vadd.xlane.f32.xlu1 %v3585_v15 }
0x20ab   :  { %v3584_v17 = vpop.xlane.xlu0 %3583 }
0x20ac   :  { %v3588_v18 = vmul.f32 0.03125, %v3584_v17 }
0x20ad   :  { %v3587_v19 = vpop.xlane.xlu1 %3586 }
0x20ae   :  { %v3590_v5 = vsub.f32 %v3576_v4, %v3588_v18  ;;  %v3589_v6 = vmul.f32 0.03125, %v3587_v19 }
0x20b0   :  { %v3591_v52 = vsub.f32 %v3577_v9, %v3589_v6  ;;  %v3592_v20 = vmul.f32 %v3590_v5, %v3590_v5 }
0x20b2   :  { %v3594_v21 = vsel %vm58_vm0, %v3592_v20, 0.0  ;;  %v3593_v22 = vmul.f32 %v3591_v52, %v3591_v52 }
0x20b3   :  { %3595 = vadd.xlane.f32.xlu0 %v3594_v21 }
0x20b4   :  { %v3597_v11 = vsel %vm58_vm0, %v3593_v22, 0.0 }
0x20b5   :  { %3598 = vadd.xlane.f32.xlu1 %v3597_v11 }
0x2140   :  { %v3596_v59 = vpop.xlane.xlu0 %3595 }
0x2141   :  { %v3600_v13 = vmul.f32 0.03125, %v3596_v59 }
0x2142   :  { %v3599_v10 = vpop.xlane.xlu1 %3598 }
0x2143   :  { %v3602_v23 = vadd.f32 1e-12, %v3600_v13  ;;  %v3601_v24 = vmul.f32 0.03125, %v3599_v10 }
0x2145   :  { %4232 = vrsqrt.f32 %v3602_v23  ;;  %v3603_v25 = vadd.f32 1e-12, %v3601_v24 }
0x2147   :  { %4234 = vrsqrt.f32 %v3603_v25 }
0x214f   :  { %v4233_v43 = vpop.eup %4232 }
0x2150   :  { %v3606_v27 = vmul.f32 %v4233_v43, %v3590_v5 }
0x2151   :  { %v4235_v45 = vpop.eup %4234 }
0x2152   :  { %v3614_v29 = vmul.f32 %v3752_v26, %v3606_v27  ;;  %v3607_v30 = vmul.f32 %v4235_v45, %v3591_v52 }
0x2154   :  { %v3622_v16 = vadd.f32 %v3753_v28, %v3614_v29  ;;  %v3615_v33 = vmul.f32 %v3752_v26, %v3607_v30 }
0x2156   :  { %3624 = vst.msk [vmem:[%s4923_s16] sm:$0xff] %vm58_vm0, %v3622_v16  ;;  %v3623_v34 = vadd.f32 %v3753_v28, %v3615_v33 }
0x2158   :  { %3625 = vst.msk [vmem:[%s4923_s16 + $0x8] sm:$0xff] %vm58_vm0, %v3623_v34 }

</bundles_post_ra>
